<compile_context>
chip_gen: v7x
topology: tpu7x:2x2x1
jax: 0.10.0
libtpu: 0.0.40
codegen_flags: <defaults>
</compile_context>

<pallas_src>
import functools

import jax
import jax.numpy as jnp
from jax.experimental import pallas as pl
from jax.experimental.pallas import tpu as pltpu

LANE = 128  # TPU lane width: channel axes are padded to a multiple of this.


def _round_up(n, m):
    return ((n + m - 1) // m) * m


def _dwsep_conv_kernel(x_ref, dw_ref, pw_ref, pb_ref, o_ref, *, k):
    """Fused depthwise KxK + pointwise 1x1 conv for one NHWC image.

    x_ref : (1, H+2p, W+2p, C)   halo-padded input, channels on lanes
    dw_ref: (K*K, C)             depthwise taps, row index = dy*K + dx
    pw_ref: (C, Co)              pointwise weight, (in, out) for x @ W
    pb_ref: (1, Co)              pointwise bias (depthwise bias pre-folded)
    o_ref : (1, H, W, Co)
    """
    _, H, W, Co = o_ref.shape

    dw = dw_ref[...].astype(jnp.float32)            # (K*K, C), load + cast once

    # --- depthwise KxK conv: shifted FMAs on the VPU, f32 accumulate -------
    acc = None
    for dx in range(k):                             # static taps -> unrolled
        # One sublane (W-axis) shift + one cast per dx (K total, not K*K).
        slab = x_ref[0, :, dx:dx + W, :].astype(jnp.float32)   # (H+2p, W, C)
        for dy in range(k):
            term = slab[dy:dy + H] * dw[dy * k + dx]           # row select is free
            acc = term if acc is None else acc + term

    # --- pointwise 1x1 conv: channel matmul on the MXU ---------------------
    lhs = acc.reshape(H * W, acc.shape[-1])
    if pw_ref.dtype != jnp.float32:
        lhs = lhs.astype(pw_ref.dtype)              # bf16 MXU operands if model is bf16
    y = jnp.dot(lhs, pw_ref[...], preferred_element_type=jnp.float32)
    y = y + pb_ref[...]                             # single fused bias add
    o_ref[...] = y.reshape(1, H, W, Co).astype(o_ref.dtype)


def depthwise_separable_conv2d(x, depth_w, depth_b, point_w, point_b,
                               *, kernel_size=3, stride=1):
    """NCHW forward of DepthwiseSeparableConv2d (spatial_separation=False).

    x       : (N, Cin, H, W)
    depth_w : (Cin, 1, K, K)    depth_conv.weight (groups=Cin)
    depth_b : (Cin,)            depth_conv.bias
    point_w : (Cout, Cin, 1, 1) point_conv.weight
    point_b : (Cout,)           point_conv.bias
    """
    if stride != 1:
        # TODO(synk): stride > 1 needs strided tap gathers and a smaller output tile.
        raise NotImplementedError("only stride=1 (the module default) is implemented")
    # TODO(synk): spatial_separation=True branch (1xK then Kx1 depthwise convs,
    # each with its own bias and zero padding) is not implemented; the default
    # constructor path (spatial_separation=False) is covered.

    N, Cin, H, W = x.shape
    K = kernel_size
    p = K // 2
    Cout = point_w.shape[0]
    Cp = _round_up(Cin, LANE)    # lane-dense input channels
    Cop = _round_up(Cout, LANE)  # lane-dense output channels -> unmasked stores
    dtype = x.dtype

    # Layout plumbing (wrapper side): NCHW -> NHWC, halo + channel zero-padding.
    x_nhwc = jnp.transpose(x, (0, 2, 3, 1))
    x_pad = jnp.pad(x_nhwc, ((0, 0), (p, p), (p, p), (0, Cp - Cin))).astype(dtype)

    dw = jnp.transpose(depth_w[:, 0], (1, 2, 0))                 # (K, K, Cin)
    dw = jnp.pad(dw, ((0, 0), (0, 0), (0, Cp - Cin)))
    dw = dw.reshape(K * K, Cp).astype(dtype)                     # row = dy*K + dx

    pw = jnp.transpose(point_w[:, :, 0, 0], (1, 0))              # (Cin, Cout)
    pw = jnp.pad(pw, ((0, Cp - Cin), (0, Cop - Cout))).astype(dtype)

    # Fold the depthwise bias into the pointwise bias (exact: 1x1 conv is linear).
    db = jnp.pad(depth_b, (0, Cp - Cin)).astype(jnp.float32)
    pb = jnp.pad(point_b, (0, Cop - Cout)).astype(jnp.float32)
    pb_eff = (jnp.dot(db, pw.astype(jnp.float32),
                      precision=jax.lax.Precision.HIGHEST) + pb).reshape(1, Cop)

    Hp, Wp = H + 2 * p, W + 2 * p

    # Explicit, modest VMEM budget derived from the actual per-step working set
    # (double-buffered tiles + invariant weights + f32 temporaries); the floor /
    # cap keep it valid on v5e (16 MiB default) through v7x (64 MiB physical).
    itemsize = jnp.dtype(dtype).itemsize
    block_bytes = ((Hp * Wp * Cp + H * W * Cop) * itemsize
                   + (K * K * Cp + Cp * Cop) * itemsize
                   + Cop * 4)
    vmem_limit = int(min(64 * 1024 * 1024,
                         max(16 * 1024 * 1024, 4 * block_bytes)))

    out = pl.pallas_call(
        functools.partial(_dwsep_conv_kernel, k=K),
        out_shape=jax.ShapeDtypeStruct((N, H, W, Cop), dtype),
        grid_spec=pltpu.PrefetchScalarGridSpec(
            num_scalar_prefetch=0,
            grid=(N,),                                   # one whole image per step
            in_specs=[
                pl.BlockSpec((1, Hp, Wp, Cp), lambda n: (n, 0, 0, 0)),
                # Invariant blocks (constant index_map): fetched once, not
                # re-streamed per grid step; their buffering is negligible
                # next to the image tiles.
                pl.BlockSpec((K * K, Cp), lambda n: (0, 0)),
                pl.BlockSpec((Cp, Cop), lambda n: (0, 0)),
                pl.BlockSpec((1, Cop), lambda n: (0, 0)),
            ],
            out_specs=pl.BlockSpec((1, H, W, Cop), lambda n: (n, 0, 0, 0)),
        ),
        compiler_params=pltpu.CompilerParams(
            dimension_semantics=("parallel",),           # batch shards across TCs
            vmem_limit_bytes=vmem_limit,
        ),
    )(x_pad, dw, pw, pb_eff)

    out = out[:, :, :, :Cout]                            # drop channel padding
    return jnp.transpose(out, (0, 3, 1, 2))              # back to NCHW


def _reference(x, depth_w, depth_b, point_w, point_b, k):
    """Pure-JAX reference of DepthwiseSeparableConv2d.forward (NCHW)."""
    p = k // 2
    y = jax.lax.conv_general_dilated(
        x, depth_w, window_strides=(1, 1), padding=[(p, p), (p, p)],
        dimension_numbers=("NCHW", "OIHW", "NCHW"),
        feature_group_count=x.shape[1],
        precision=jax.lax.Precision.HIGHEST)
    y = y + depth_b[None, :, None, None]
    z = jax.lax.conv_general_dilated(
        y, point_w, window_strides=(1, 1), padding="VALID",
        dimension_numbers=("NCHW", "OIHW", "NCHW"),
        precision=jax.lax.Precision.HIGHEST)
    return z + point_b[None, :, None, None]


if __name__ == "__main__":
    N, Cin, Cout, H, W, K = 2, 4, 8, 16, 16, 3
    key = jax.random.PRNGKey(0)
    kx, kdw, kdb, kpw, kpb = jax.random.split(key, 5)

    x = jax.random.normal(kx, (N, Cin, H, W), dtype=jnp.float32)
    depth_w = jax.random.normal(kdw, (Cin, 1, K, K), dtype=jnp.float32) / K
    depth_b = jax.random.normal(kdb, (Cin,), dtype=jnp.float32) * 0.1
    point_w = (jax.random.normal(kpw, (Cout, Cin, 1, 1), dtype=jnp.float32)
               / jnp.sqrt(jnp.float32(Cin)))
    point_b = jax.random.normal(kpb, (Cout,), dtype=jnp.float32) * 0.1

    out = depthwise_separable_conv2d(x, depth_w, depth_b, point_w, point_b,
                                     kernel_size=K, stride=1)
    out = jax.block_until_ready(out)

    ref = _reference(x, depth_w, depth_b, point_w, point_b, K)
    assert out.shape == ref.shape == (N, Cout, H, W)
    assert jnp.allclose(out, ref, atol=1e-3, rtol=1e-3), "mismatch vs reference"
    print("KERNEL_OK")
</pallas_src>

<mosaic_0001>
module attributes {stable_mosaic.version = 11 : i64} {
  func.func @_dwsep_conv_kernel(%arg0: i32, %arg1: memref<1x18x18x128xf32, #tpu.memory_space<vmem>>, %arg2: memref<9x128xf32, #tpu.memory_space<vmem>>, %arg3: memref<128x128xf32, #tpu.memory_space<vmem>>, %arg4: memref<1x128xf32, #tpu.memory_space<vmem>>, %arg5: memref<1x16x16x128xf32, #tpu.memory_space<vmem>>) attributes {dimension_semantics = [#tpu.dimension_semantics<parallel>], iteration_bounds = array<i64: 2>, scalar_prefetch = 0 : i64, scratch_operands = 0 : i64, tpu.core_type = #tpu.core_type<tc>, window_params = [{transform_indices = @transform_0, window_bounds = array<i64: 1, 18, 18, 128>}, {pipeline_mode = #tpu.pipeline_mode<synchronous>, transform_indices = @transform_1, window_bounds = array<i64: 9, 128>}, {pipeline_mode = #tpu.pipeline_mode<synchronous>, transform_indices = @transform_2, window_bounds = array<i64: 128, 128>}, {pipeline_mode = #tpu.pipeline_mode<synchronous>, transform_indices = @transform_3, window_bounds = array<i64: 1, 128>}, {transform_indices = @transform_4, window_bounds = array<i64: 1, 16, 16, 128>}]} {
    %c0 = arith.constant 0 : index
    %c0_0 = arith.constant 0 : index
    %0 = vector.load %arg2[%c0, %c0_0] : memref<9x128xf32, #tpu.memory_space<vmem>>, vector<9x128xf32>
    %c0_1 = arith.constant 0 : index
    %c0_2 = arith.constant 0 : index
    %c0_3 = arith.constant 0 : index
    %c0_4 = arith.constant 0 : index
    %1 = vector.load %arg1[%c0_1, %c0_2, %c0_3, %c0_4] : memref<1x18x18x128xf32, #tpu.memory_space<vmem>>, vector<1x18x16x128xf32>
    %2 = vector.shape_cast %1 : vector<1x18x16x128xf32> to vector<18x16x128xf32>
    %3 = vector.extract_strided_slice %2 {offsets = [0, 0, 0], sizes = [16, 16, 128], strides = [1, 1, 1]} : vector<18x16x128xf32> to vector<16x16x128xf32>
    %4 = vector.extract_strided_slice %0 {offsets = [0, 0], sizes = [1, 128], strides = [1, 1]} : vector<9x128xf32> to vector<1x128xf32>
    %5 = vector.shape_cast %4 : vector<1x128xf32> to vector<128xf32>
    %6 = vector.shape_cast %5 : vector<128xf32> to vector<1x1x128xf32>
    %7 = vector.broadcast %6 : vector<1x1x128xf32> to vector<16x16x128xf32>
    %8 = arith.mulf %3, %7 : vector<16x16x128xf32>
    %9 = vector.extract_strided_slice %2 {offsets = [1, 0, 0], sizes = [16, 16, 128], strides = [1, 1, 1]} : vector<18x16x128xf32> to vector<16x16x128xf32>
    %10 = vector.extract_strided_slice %0 {offsets = [3, 0], sizes = [1, 128], strides = [1, 1]} : vector<9x128xf32> to vector<1x128xf32>
    %11 = vector.shape_cast %10 : vector<1x128xf32> to vector<128xf32>
    %12 = vector.shape_cast %11 : vector<128xf32> to vector<1x1x128xf32>
    %13 = vector.broadcast %12 : vector<1x1x128xf32> to vector<16x16x128xf32>
    %14 = arith.mulf %9, %13 : vector<16x16x128xf32>
    %15 = arith.addf %8, %14 : vector<16x16x128xf32>
    %16 = vector.extract_strided_slice %2 {offsets = [2, 0, 0], sizes = [16, 16, 128], strides = [1, 1, 1]} : vector<18x16x128xf32> to vector<16x16x128xf32>
    %17 = vector.extract_strided_slice %0 {offsets = [6, 0], sizes = [1, 128], strides = [1, 1]} : vector<9x128xf32> to vector<1x128xf32>
    %18 = vector.shape_cast %17 : vector<1x128xf32> to vector<128xf32>
    %19 = vector.shape_cast %18 : vector<128xf32> to vector<1x1x128xf32>
    %20 = vector.broadcast %19 : vector<1x1x128xf32> to vector<16x16x128xf32>
    %21 = arith.mulf %16, %20 : vector<16x16x128xf32>
    %22 = arith.addf %15, %21 : vector<16x16x128xf32>
    %c0_5 = arith.constant 0 : index
    %c0_6 = arith.constant 0 : index
    %c1 = arith.constant 1 : index
    %c0_7 = arith.constant 0 : index
    %23 = vector.load %arg1[%c0_5, %c0_6, %c1, %c0_7] : memref<1x18x18x128xf32, #tpu.memory_space<vmem>>, vector<1x18x16x128xf32>
    %24 = vector.shape_cast %23 : vector<1x18x16x128xf32> to vector<18x16x128xf32>
    %25 = vector.extract_strided_slice %24 {offsets = [0, 0, 0], sizes = [16, 16, 128], strides = [1, 1, 1]} : vector<18x16x128xf32> to vector<16x16x128xf32>
    %26 = vector.extract_strided_slice %0 {offsets = [1, 0], sizes = [1, 128], strides = [1, 1]} : vector<9x128xf32> to vector<1x128xf32>
    %27 = vector.shape_cast %26 : vector<1x128xf32> to vector<128xf32>
    %28 = vector.shape_cast %27 : vector<128xf32> to vector<1x1x128xf32>
    %29 = vector.broadcast %28 : vector<1x1x128xf32> to vector<16x16x128xf32>
    %30 = arith.mulf %25, %29 : vector<16x16x128xf32>
    %31 = arith.addf %22, %30 : vector<16x16x128xf32>
    %32 = vector.extract_strided_slice %24 {offsets = [1, 0, 0], sizes = [16, 16, 128], strides = [1, 1, 1]} : vector<18x16x128xf32> to vector<16x16x128xf32>
    %33 = vector.extract_strided_slice %0 {offsets = [4, 0], sizes = [1, 128], strides = [1, 1]} : vector<9x128xf32> to vector<1x128xf32>
    %34 = vector.shape_cast %33 : vector<1x128xf32> to vector<128xf32>
    %35 = vector.shape_cast %34 : vector<128xf32> to vector<1x1x128xf32>
    %36 = vector.broadcast %35 : vector<1x1x128xf32> to vector<16x16x128xf32>
    %37 = arith.mulf %32, %36 : vector<16x16x128xf32>
    %38 = arith.addf %31, %37 : vector<16x16x128xf32>
    %39 = vector.extract_strided_slice %24 {offsets = [2, 0, 0], sizes = [16, 16, 128], strides = [1, 1, 1]} : vector<18x16x128xf32> to vector<16x16x128xf32>
    %40 = vector.extract_strided_slice %0 {offsets = [7, 0], sizes = [1, 128], strides = [1, 1]} : vector<9x128xf32> to vector<1x128xf32>
    %41 = vector.shape_cast %40 : vector<1x128xf32> to vector<128xf32>
    %42 = vector.shape_cast %41 : vector<128xf32> to vector<1x1x128xf32>
    %43 = vector.broadcast %42 : vector<1x1x128xf32> to vector<16x16x128xf32>
    %44 = arith.mulf %39, %43 : vector<16x16x128xf32>
    %45 = arith.addf %38, %44 : vector<16x16x128xf32>
    %c0_8 = arith.constant 0 : index
    %c0_9 = arith.constant 0 : index
    %c2 = arith.constant 2 : index
    %c0_10 = arith.constant 0 : index
    %46 = vector.load %arg1[%c0_8, %c0_9, %c2, %c0_10] : memref<1x18x18x128xf32, #tpu.memory_space<vmem>>, vector<1x18x16x128xf32>
    %47 = vector.shape_cast %46 : vector<1x18x16x128xf32> to vector<18x16x128xf32>
    %48 = vector.extract_strided_slice %47 {offsets = [0, 0, 0], sizes = [16, 16, 128], strides = [1, 1, 1]} : vector<18x16x128xf32> to vector<16x16x128xf32>
    %49 = vector.extract_strided_slice %0 {offsets = [2, 0], sizes = [1, 128], strides = [1, 1]} : vector<9x128xf32> to vector<1x128xf32>
    %50 = vector.shape_cast %49 : vector<1x128xf32> to vector<128xf32>
    %51 = vector.shape_cast %50 : vector<128xf32> to vector<1x1x128xf32>
    %52 = vector.broadcast %51 : vector<1x1x128xf32> to vector<16x16x128xf32>
    %53 = arith.mulf %48, %52 : vector<16x16x128xf32>
    %54 = arith.addf %45, %53 : vector<16x16x128xf32>
    %55 = vector.extract_strided_slice %47 {offsets = [1, 0, 0], sizes = [16, 16, 128], strides = [1, 1, 1]} : vector<18x16x128xf32> to vector<16x16x128xf32>
    %56 = vector.extract_strided_slice %0 {offsets = [5, 0], sizes = [1, 128], strides = [1, 1]} : vector<9x128xf32> to vector<1x128xf32>
    %57 = vector.shape_cast %56 : vector<1x128xf32> to vector<128xf32>
    %58 = vector.shape_cast %57 : vector<128xf32> to vector<1x1x128xf32>
    %59 = vector.broadcast %58 : vector<1x1x128xf32> to vector<16x16x128xf32>
    %60 = arith.mulf %55, %59 : vector<16x16x128xf32>
    %61 = arith.addf %54, %60 : vector<16x16x128xf32>
    %62 = vector.extract_strided_slice %47 {offsets = [2, 0, 0], sizes = [16, 16, 128], strides = [1, 1, 1]} : vector<18x16x128xf32> to vector<16x16x128xf32>
    %63 = vector.extract_strided_slice %0 {offsets = [8, 0], sizes = [1, 128], strides = [1, 1]} : vector<9x128xf32> to vector<1x128xf32>
    %64 = vector.shape_cast %63 : vector<1x128xf32> to vector<128xf32>
    %65 = vector.shape_cast %64 : vector<128xf32> to vector<1x1x128xf32>
    %66 = vector.broadcast %65 : vector<1x1x128xf32> to vector<16x16x128xf32>
    %67 = arith.mulf %62, %66 : vector<16x16x128xf32>
    %68 = arith.addf %61, %67 : vector<16x16x128xf32>
    %69 = vector.shape_cast %68 : vector<16x16x128xf32> to vector<256x128xf32>
    %c0_11 = arith.constant 0 : index
    %c0_12 = arith.constant 0 : index
    %70 = vector.load %arg3[%c0_11, %c0_12] : memref<128x128xf32, #tpu.memory_space<vmem>>, vector<128x128xf32>
    %cst = arith.constant dense<0.000000e+00> : vector<256x128xf32>
    %71 = tpu.matmul %69, %70, %cst {dimension_numbers = #tpu.dot_dimension_numbers<[1], [0], [0], [1], [0, 0, 1, 1], [], []>} : vector<256x128xf32>, vector<128x128xf32>, vector<256x128xf32> -> vector<256x128xf32>
    %c0_13 = arith.constant 0 : index
    %c0_14 = arith.constant 0 : index
    %72 = vector.load %arg4[%c0_13, %c0_14] : memref<1x128xf32, #tpu.memory_space<vmem>>, vector<1x128xf32>
    %73 = vector.broadcast %72 : vector<1x128xf32> to vector<256x128xf32>
    %74 = arith.addf %71, %73 : vector<256x128xf32>
    %75 = vector.shape_cast %74 : vector<256x128xf32> to vector<1x16x16x128xf32>
    %c0_15 = arith.constant 0 : index
    %c0_16 = arith.constant 0 : index
    %c0_17 = arith.constant 0 : index
    %c0_18 = arith.constant 0 : index
    %76 = vector.load %arg5[%c0_15, %c0_16, %c0_17, %c0_18] : memref<1x16x16x128xf32, #tpu.memory_space<vmem>>, vector<1x16x16x128xf32>
    tpu.vector_store %arg5[%c0_15, %c0_16, %c0_17, %c0_18], %75 {strides = array<i32>} : memref<1x16x16x128xf32, #tpu.memory_space<vmem>>, vector<1x16x16x128xf32>,
    return
  }
  func.func @transform_0(%arg0: i32) -> (i32, i32, i32, i32) {
    %c0_i32 = arith.constant 0 : i32
    %c0_i32_0 = arith.constant 0 : i32
    %c0_i32_1 = arith.constant 0 : i32
    %c0_i32_2 = arith.constant 0 : i32
    return %arg0, %c0_i32, %c0_i32_0, %c0_i32_1 : i32, i32, i32, i32
  }
  func.func @transform_1(%arg0: i32) -> (i32, i32) {
    %c0_i32 = arith.constant 0 : i32
    %c0_i32_0 = arith.constant 0 : i32
    %c0_i32_1 = arith.constant 0 : i32
    return %c0_i32, %c0_i32_0 : i32, i32
  }
  func.func @transform_2(%arg0: i32) -> (i32, i32) {
    %c0_i32 = arith.constant 0 : i32
    %c0_i32_0 = arith.constant 0 : i32
    %c0_i32_1 = arith.constant 0 : i32
    return %c0_i32, %c0_i32_0 : i32, i32
  }
  func.func @transform_3(%arg0: i32) -> (i32, i32) {
    %c0_i32 = arith.constant 0 : i32
    %c0_i32_0 = arith.constant 0 : i32
    %c0_i32_1 = arith.constant 0 : i32
    return %c0_i32, %c0_i32_0 : i32, i32
  }
  func.func @transform_4(%arg0: i32) -> (i32, i32, i32, i32) {
    %c0_i32 = arith.constant 0 : i32
    %c0_i32_0 = arith.constant 0 : i32
    %c0_i32_1 = arith.constant 0 : i32
    %c0_i32_2 = arith.constant 0 : i32
    return %arg0, %c0_i32, %c0_i32_0, %c0_i32_1 : i32, i32, i32, i32
  }
}

</mosaic_0001>

<bundles_post_ra>
// kernel: tpu_custom_call.1
= control target key start
LH: loop header
LB: loop body
LE: loop exit
PB: predicated region body
PF: predicated region fallthrough
CT: control target
= control target key end

     0   :  { %9 = vsyncpa [#allocation3], 0  ;;  %s2739_s0 = inlined_call_operand.vmem [shape: f32[2,18,18,128], index: 0, kind: input, shape index: {}]   ;;  %s2740_s1 = inlined_call_operand.vmem [shape: f32[9,128], index: 1, kind: input, shape index: {}]   ;;  %s2741_s2 = inlined_call_operand.vmem [shape: f32[128,128], index: 2, kind: input, shape index: {}]   ;;  %s2742_s3 = inlined_call_operand.vmem [shape: f32[1,128], index: 3, kind: input, shape index: {}]   ;;  %s2743_s4 = inlined_call_operand.hbm [shape: f32[2,16,16,128], index: 4, kind: output, shape index: {}]  }
   0x1   :  { %11 = vsyncpa [#allocation3 + $0x1], 0  ;;  %s1579_s15 = smov 0   ;;  %s1581_s16 = smov 0  }
   0x2   :  { %s1583_s17 = smov 0   ;;  %s1585_s18 = smov 0  }
   0x3 LB: > { %s1600_s19 = sadd.s32 4294967295, %s1549_s18   ;;  %s1242_s20 = sadd.s32 4294967294, %s1549_s18   ;;  %s1549_s18 = sphi %s1585_s18, %s2758_s18   ;;  %s1545_s17 = sphi %s1583_s17, %s2757_s17   ;;  %s1541_s16 = sphi %s1581_s16, %s2756_s16   ;;  %s1537_s15 = sphi %s1579_s15, %s2755_s15  }
   0x4   : > { %s1604_s21 = sadd.s32 1, %s1549_s18   ;;  %s113_s22 = sadd.s32 1, %s1545_s17 }
   0x5   : > { %s110_s23 = ssub.s32 %s1549_s18, %s1604_s21  ;;  %p123_p0 = scmp.ne.s32.totalorder %s1545_s17, %s1541_s16 }
   0x6   : > { %p111_p1 = scmp.eq.s32.totalorder %s110_s23, 0  ;;  %p124_p2 = scmp.eq.s32.totalorder %s1600_s19, 1 }
   0x7   : > { %p129_p3 = scmp.ne.s32.totalorder %s1541_s16, %s1537_s15  ;;  %p130_p4 = scmp.eq.s32.totalorder %s1242_s20, 1 }
   0x8   : > { %s1615_s24 = scalar_select %p111_p1, %s1545_s17, %s113_s22  }
   0x9   : > { %p1617_p5 = por %p124_p2, %p123_p0  ;;  %p1621_p6 = por %p130_p4, %p129_p3 }
   0xa   : > { %p1245_p7 = scmp.ge.s32.totalorder %s1549_s18, 1  ;;  %p165_p8 = scmp.lt.s32.totalorder %s1549_s18, 3 }
   0xc   : > { %p166_p9 = pnand %p1245_p7, %p165_p8 }
   0xe   : > { %169 = sbr.rel (%p166_p9) target bundleno = 408 (0x198), region = 36 }
  0x15   : > { %v886_v0 = vld [vmem:[%s2741_s2] sm:$0xff]  ;;  %v887_v1 = vld [vmem:[%s2741_s2 + $0x8] sm:$0xff]  ;;  %v888_v2 = vld [vmem:[%s2741_s2 + $0x10] sm:$0xff]  ;;  %p191_p10 = scmp.lt.s32.totalorder %s1600_s19, 1  ;;  %v234_v3 = vlaneseq  ;;  %s188_s10 = sand.u32 1, %s1541_s16  }
  0x16   : > { %v1384_v4 = vpack.c.bf16 %v887_v1, %v886_v0  ;;  %v889_v5 = vld [vmem:[%s2741_s2 + $0x18] sm:$0xff]  ;;  %v890_v7 = vld [vmem:[%s2741_s2 + $0x20] sm:$0xff]  ;;  %v891_v8 = vld [vmem:[%s2741_s2 + $0x28] sm:$0xff]  ;;  %s1246_s11 = sshll.u32 %s188_s10, 8  ;;  %s1255_s20 = sshll.u32 %s1600_s19, 12 }
  0x17   : > { %v1388_v6 = vpack.c.bf16 %v889_v5, %v888_v2  ;;  %s192_s13 = scalar_select %p191_p10, %s1600_s19, 1  ;;  %v1647_v9 = vshrl.u32 %v234_v3, 7  ;;  %v892_v10 = vld [vmem:[%s2741_s2 + $0x30] sm:$0xff]  ;;  %v893_v11 = vld [vmem:[%s2741_s2 + $0x38] sm:$0xff]  ;;  %v894_v12 = vld [vmem:[%s2741_s2 + $0x40] sm:$0xff]  ;;  %v1392_v17 = vpack.c.bf16 %v891_v8, %v890_v7 }
  0x18   : > { %1385 = vmatprep.subr.bf16.mxu0 %v1384_v4  ;;  %1416 = vmatprep.subr.bf16.mxu1 %v1384_v4  ;;  %v895_v13 = vld [vmem:[%s2741_s2 + $0x48] sm:$0xff]  ;;  %v896_v14 = vld [vmem:[%s2741_s2 + $0x50] sm:$0xff]  ;;  %v897_v18 = vld [vmem:[%s2741_s2 + $0x58] sm:$0xff]  ;;  %v1396_v23 = vpack.c.bf16 %v893_v11, %v892_v10  ;;  %s2689_s28 = scalar_lea.hbm %s2743_s4, %s1255_s20  ;;  %s2698_s19 = scalar_lea.sflag [#allocation3], %s188_s10 }
  0x19   : > { %1387 = vmatpush3.bf16.msra.mxu0 %v1384_v4  ;;  %1424 = vmatpush3.bf16.msra.mxu1 %v1384_v4  ;;  %s1432_s7 = smul.u32 432, %s192_s13  ;;  %v236_v15 = vsub.s32 0, %v1647_v9  ;;  %v272_v16 = vsub.s32 3, %v1647_v9  ;;  %v898_v19 = vld [vmem:[%s2741_s2 + $0x60] sm:$0xff]  ;;  %v340_v21 = vsub.s32 6, %v1647_v9  ;;  %v444_v22 = vsub.s32 1, %v1647_v9 }
  0x1a   : > { %1389 = vmatprep.subr.bf16.mxu0 %v1388_v6  ;;  %1417 = vmatprep.subr.bf16.mxu1 %v1388_v6  ;;  %v196_v20 = vld [vmem:[%s2740_s1] sm:$0xff]  ;;  %v899_v24 = vld [vmem:[%s2741_s2 + $0x68] sm:$0xff]  ;;  %v900_v25 = vld [vmem:[%s2741_s2 + $0x70] sm:$0xff]  ;;  %v512_v29 = vsub.s32 4, %v1647_v9  ;;  %v580_v35 = vsub.s32 7, %v1647_v9  ;;  %v684_v36 = vsub.s32 2, %v1647_v9  ;;  %v1705_v37 = vpack.c.bf16 %v895_v13, %v894_v12 }
  0x1b   : > { %v901_v26 = vld [vmem:[%s2741_s2 + $0x78] sm:$0xff]  ;;  %s1689_s5 = scalar_lea.vmem %s2739_s0, %s1432_s7  ;;  %v1691_v27 = vrot.slane %v196_v20, %v236_v15  ;;  %v1693_v28 = vrot.slane %v196_v20, %v272_v16  ;;  %v1699_v33 = vrot.slane %v196_v20, %v340_v21  ;;  %v1701_v34 = vrot.slane %v196_v20, %v444_v22  ;;  %v1727_v49 = vld [vmem:[%s2740_s1 + $0x8] ss:$0 sm:$0xff]  ;;  %s2623_s13 = scalar_lea.vmem [#allocation2], %s1246_s11 }
  0x1c   : > { %v198_v30 = vld [vmem:[%s1689_s5] sm:$0xff]  ;;  %v200_v31 = vld [vmem:[%s1689_s5 + $0x18] sm:$0xff]  ;;  %v202_v32 = vld [vmem:[%s1689_s5 + $0x30] sm:$0xff]  ;;  %v1707_v38 = vpack.c.bf16 %v897_v18, %v896_v14  ;;  %v1711_v41 = vpack.c.bf16 %v899_v24, %v898_v19  ;;  %v1715_v44 = vpack.c.bf16 %v901_v26, %v900_v25  ;;  %v1721_v47 = vrot.slane %v196_v20, %v512_v29  ;;  %s1180_s22 = sshll.u32 %s2623_s13, 4  ;;  %s1551_s30 = smov [#allocation2]   ;;  %s2691_s22 = int_to_ptr.vmem [resolvable:$true] %s1180_s22 }
  0x1d   : > { %1391 = vmatpush3.bf16.msra.mxu0 %v1388_v6  ;;  %1425 = vmatpush3.bf16.msra.mxu1 %v1388_v6  ;;  %v238_v39 = vmul.f32 %v1691_v27, %v198_v30  ;;  %v406_v40 = vld [vmem:[%s1689_s5 + $0x1] sm:$0xff]  ;;  %v274_v42 = vmul.f32 %v1693_v28, %v200_v31  ;;  %v342_v43 = vmul.f32 %v1699_v33, %v202_v32  ;;  %v408_v46 = vld [vmem:[%s1689_s5 + $0x19] sm:$0xff]  ;;  %v752_v48 = vsub.s32 5, %v1647_v9  ;;  %v410_v51 = vld [vmem:[%s1689_s5 + $0x31] sm:$0xff]  ;;  %s1487_s29 = scalar_lea.vmem %s2691_s22, 4096 }
  0x1e   : > { %1393 = vmatprep.subr.bf16.mxu0 %v1392_v17  ;;  %1418 = vmatprep.subr.bf16.mxu1 %v1392_v17  ;;  %v1718_v45 = vmul.f32 %v1691_v27, %v200_v31  ;;  %v446_v52 = vmul.f32 %v1701_v34, %v406_v40  ;;  %v1731_v53 = vrot.slane %v196_v20, %v580_v35  ;;  %v650_v54 = vld [vmem:[%s1689_s5 + $0x32] sm:$0xff]  ;;  %v646_v59 = vld [vmem:[%s1689_s5 + $0x2] sm:$0xff]  ;;  %v648_v8 = vld [vmem:[%s1689_s5 + $0x1a] sm:$0xff]  ;;  %p1488_p11 = scmp.ne.s32.totalorder %s2691_s22, %s1487_s29 }
  0x1f   : > { %v306_v50 = vadd.f32 %v274_v42, %v238_v39  ;;  %v1734_v55 = vrot.slane %v196_v20, %v684_v36  ;;  %v1737_v56 = vmul.f32 %v1691_v27, %v202_v32  ;;  %v1740_v57 = vmul.f32 %v1693_v28, %v202_v32  ;;  %v1747_v60 = vld [vmem:[%s1689_s5 + $0xc0] sm:$0xff]  ;;  %v1750_v61 = vld [vmem:[%s1689_s5 + $0xd8] sm:$0xff]  ;;  %v218_v1 = vld [vmem:[%s1689_s5 + $0xf0] sm:$0xff] }
  0x20   : > { %v1743_v58 = vmul.f32 %v1701_v34, %v408_v46  ;;  %v1753_v63 = vmul.f32 %v1701_v34, %v410_v51  ;;  %v514_v0 = vmul.f32 %v1721_v47, %v408_v46  ;;  %v1758_v2 = vmul.f32 %v1721_v47, %v410_v51  ;;  %v422_v6 = vld [vmem:[%s1689_s5 + $0xc1] sm:$0xff]  ;;  %v424_v15 = vld [vmem:[%s1689_s5 + $0xd9] sm:$0xff]  ;;  %v426_v18 = vld [vmem:[%s1689_s5 + $0xf1] sm:$0xff]  ;;  %p1489_p12 = pnand %p1488_p11, %p1617_p5 }
  0x21   : > { %1395 = vmatpush3.bf16.msra.mxu0 %v1392_v17  ;;  %1426 = vmatpush3.bf16.msra.mxu1 %v1392_v17  ;;  %v374_v62 = vadd.f32 %v342_v43, %v306_v50  ;;  %v582_v3 = vmul.f32 %v1731_v53, %v410_v51  ;;  %v1761_v4 = vrot.slane %v196_v20, %v752_v48  ;;  %v662_v24 = vld [vmem:[%s1689_s5 + $0xc2] sm:$0xff]  ;;  %v1805_v35 = vld [vmem:[%s1689_s5 + $0x38] sm:$0xff] }
  0x22   : > { %1397 = vmatprep.subr.bf16.mxu0 %v1396_v23  ;;  %1419 = vmatprep.subr.bf16.mxu1 %v1396_v23  ;;  %v1764_v5 = vmul.f32 %v1727_v49, %v650_v54  ;;  %v686_v9 = vmul.f32 %v1734_v55, %v646_v59  ;;  %v254_v10 = vmul.f32 %v1691_v27, %v1747_v60  ;;  %v199_v31 = vld [vmem:[%s1689_s5 + $0x8] sm:$0xff]  ;;  %v1802_v32 = vld [vmem:[%s1689_s5 + $0x20] sm:$0xff]  ;;  %v666_v50 = vld [vmem:[%s1689_s5 + $0xf2] sm:$0xff]  ;;  %p1490_p13 = pneg %p1489_p12 }
  0x23   : > { %v478_v7 = vadd.f32 %v446_v52, %v374_v62  ;;  %v290_v11 = vmul.f32 %v1693_v28, %v1750_v61  ;;  %v1774_v12 = vmul.f32 %v1734_v55, %v648_v8  ;;  %v1777_v13 = vmul.f32 %v1734_v55, %v650_v54  ;;  %v664_v42 = vld [vmem:[%s1689_s5 + $0xda] sm:$0xff]  ;;  %v407_v48 = vld [vmem:[%s1689_s5 + $0x9] sm:$0xff] }
  0x24   : > { %v358_v14 = vmul.f32 %v1699_v33, %v218_v1  ;;  %v462_v19 = vmul.f32 %v1701_v34, %v422_v6  ;;  %v754_v20 = vmul.f32 %v1761_v4, %v648_v8  ;;  %v1787_v21 = vmul.f32 %v1761_v4, %v650_v54  ;;  %v1831_v62 = vld [vmem:[%s1689_s5 + $0x21] sm:$0xff] }
  0x25   : > { %1399 = vmatpush3.bf16.msra.mxu0 %v1396_v23  ;;  %1427 = vmatpush3.bf16.msra.mxu1 %v1396_v23  ;;  %v546_v16 = vadd.f32 %v514_v0, %v478_v7  ;;  %v322_v17 = vadd.f32 %v290_v11, %v254_v10  ;;  %v1790_v22 = vmul.f32 %v1691_v27, %v218_v1  ;;  %v1838_v7 = vld [vmem:[%s1689_s5 + $0xc8] sm:$0xff]  ;;  %v1841_v8 = vld [vmem:[%s1689_s5 + $0xe0] sm:$0xff] }
  0x26   : > { %1401 = vmatprep.subr.bf16.mxu0 %v1705_v37  ;;  %1420 = vmatprep.subr.bf16.mxu1 %v1705_v37  ;;  %v1793_v23 = vmul.f32 %v1693_v28, %v218_v1  ;;  %v1797_v29 = vmul.f32 %v1701_v34, %v424_v15  ;;  %v530_v30 = vmul.f32 %v1721_v47, %v424_v15 }
  0x27   : > { %v614_v25 = vadd.f32 %v582_v3, %v546_v16  ;;  %v390_v26 = vadd.f32 %v358_v14, %v322_v17  ;;  %v1810_v36 = vmul.f32 %v1701_v34, %v426_v18  ;;  %v1813_v39 = vmul.f32 %v1721_v47, %v426_v18  ;;  %2749 = vst [vmem:[#allocation5_spill] sm:$0xff] %v1838_v7  ;;  %v1852_v14 = vld [vmem:[%s1689_s5 + $0x39] sm:$0xff]  ;;  %v647_v16 = vld [vmem:[%s1689_s5 + $0xa] sm:$0xff] }
  0x28   : > { %v598_v40 = vmul.f32 %v1731_v53, %v426_v18  ;;  %v1823_v51 = vmul.f32 %v1734_v55, %v664_v42  ;;  %v239_v52 = vmul.f32 %v1691_v27, %v199_v31  ;;  %v275_v54 = vmul.f32 %v1693_v28, %v1802_v32 }
  0x29   : > { %1403 = vmatpush3.bf16.msra.mxu0 %v1705_v37  ;;  %1428 = vmatpush3.bf16.msra.mxu1 %v1705_v37  ;;  %v718_v43 = vadd.f32 %v686_v9, %v614_v25  ;;  %v494_v46 = vadd.f32 %v462_v19, %v390_v26  ;;  %v702_v37 = vmul.f32 %v1734_v55, %v662_v24  ;;  %v1844_v9 = vld [vmem:[%s1689_s5 + $0xf8] sm:$0xff]  ;;  %v1862_v19 = vld [vmem:[%s1689_s5 + $0xc9] sm:$0xff] }
  0x2a   : > { %1405 = vmatprep.subr.bf16.mxu0 %v1707_v38  ;;  %1421 = vmatprep.subr.bf16.mxu1 %v1707_v38  ;;  %v343_v59 = vmul.f32 %v1699_v33, %v1805_v35  ;;  %v1834_v3 = vmul.f32 %v1734_v55, %v666_v50  ;;  %v770_v6 = vmul.f32 %v1761_v4, %v664_v42  ;;  %v1865_v24 = vld [vmem:[%s1689_s5 + $0x22] sm:$0xff] }
  0x2b   : > { %v786_v0 = vadd.f32 %v754_v20, %v718_v43  ;;  %v562_v1 = vadd.f32 %v530_v30, %v494_v46  ;;  %v1849_v10 = vmul.f32 %v1761_v4, %v666_v50  ;;  %v307_v11 = vadd.f32 %v275_v54, %v239_v52  ;;  %2750 = vst [vmem:[#allocation6_spill] sm:$0xff] %v1862_v19  ;;  %v1874_v30 = vld [vmem:[%s1689_s5 + $0xe1] sm:$0xff]  ;;  %v1889_v54 = vld [vmem:[%s1689_s5 + $0xf9] sm:$0xff] }
  0x2c   : > { %v447_v15 = vmul.f32 %v1701_v34, %v407_v48  ;;  %v255_v25 = vmul.f32 %v1691_v27, %v1838_v7  ;;  %v291_v26 = vmul.f32 %v1693_v28, %v1841_v8  ;;  %v583_v42 = vmul.f32 %v1731_v53, %v1852_v14  ;;  %v1881_v46 = vld [vmem:[%s1689_s5 + $0x48] sm:$0xff]  ;;  %v1886_v52 = vld [vmem:[%s1689_s5 + $0x3a] sm:$0xff] }
  0x2d   : > { %1407 = vmatpush3.bf16.msra.mxu0 %v1707_v38  ;;  %1429 = vmatpush3.bf16.msra.mxu1 %v1707_v38  ;;  %v854_v17 = vadd.f32 %v1764_v5, %v786_v0  ;;  %v630_v18 = vadd.f32 %v598_v40, %v562_v1  ;;  %v515_v38 = vmul.f32 %v1721_v47, %v1831_v62 }
  0x2e   : > { %1409 = vmatprep.subr.bf16.mxu0 %v1711_v41  ;;  %1422 = vmatprep.subr.bf16.mxu1 %v1711_v41  ;;  %v375_v20 = vadd.f32 %v343_v59, %v307_v11  ;;  %v359_v5 = vmul.f32 %v1699_v33, %v1844_v9  ;;  %v838_v40 = vmul.f32 %v1727_v49, %v666_v50 }
  0x2f   : > { %1336 = vmatprep.mubr.f32.mxu0 %v854_v17  ;;  %v734_v31 = vadd.f32 %v702_v37, %v630_v18  ;;  %v687_v43 = vmul.f32 %v1734_v55, %v647_v16  ;;  %v323_v37 = vadd.f32 %v291_v26, %v255_v25  ;;  %v463_v50 = vmul.f32 %v1701_v34, %v1862_v19  ;;  %v1910_v18 = vld [vmem:[%s1689_s5 + $0x108] sm:$0xff] }
  0x30   : > { %v479_v48 = vadd.f32 %v447_v15, %v375_v20  ;;  %v755_v0 = vmul.f32 %v1761_v4, %v1865_v24  ;;  %v1900_v15 = vld [vmem:[%s1689_s5 + $0xca] sm:$0xff]  ;;  %v308_v16 = vadd.f32 %v1740_v57, %v1718_v45  ;;  %v344_v17 = vmul.f32 %v1699_v33, %v1881_v46 }
  0x31   : > { %1411 = vmatpush3.bf16.msra.mxu0 %v1711_v41  ;;  %1430 = vmatpush3.bf16.msra.mxu1 %v1711_v41  ;;  %v802_v59 = vadd.f32 %v770_v6, %v734_v31  ;;  %v531_v41 = vmul.f32 %v1721_v47, %v1874_v30  ;;  %v391_v11 = vadd.f32 %v359_v5, %v323_v37  ;;  %v1907_v6 = vld [vmem:[%s1689_s5 + $0x49] sm:$0xff] }
  0x32   : > { %1413 = vmatprep.subr.bf16.mxu0 %v1715_v44  ;;  %1423 = vmatprep.subr.bf16.mxu1 %v1715_v44  ;;  %v547_v1 = vadd.f32 %v515_v38, %v479_v48  ;;  %2751 = vst [vmem:[#allocation7_spill] sm:$0xff] %v1900_v15  ;;  %v823_v25 = vmul.f32 %v1727_v49, %v1886_v52  ;;  %v1921_v5 = vld [vmem:[%s1689_s5 + $0xe2] sm:$0xff]  ;;  %v1927_v48 = vld [vmem:[%s1689_s5 + $0xfa] sm:$0xff] }
  0x33   : > { %v870_v20 = vadd.f32 %v838_v40, %v802_v59  ;;  %v599_v38 = vmul.f32 %v1731_v53, %v1889_v54  ;;  %v256_v26 = vmul.f32 %v1691_v27, %v1750_v61  ;;  %v495_v57 = vadd.f32 %v463_v50, %v391_v11  ;;  %v1924_v40 = vld [vmem:[%s1689_s5 + $0x50] sm:$0xff] }
  0x34   : > { %v615_v45 = vadd.f32 %v583_v42, %v547_v1  ;;  %v376_v31 = vadd.f32 %v344_v17, %v308_v16  ;;  %v703_v37 = vmul.f32 %v1734_v55, %v1900_v15  ;;  %v584_v61 = vmul.f32 %v1731_v53, %v1907_v6  ;;  %v1938_v11 = vld [vmem:[%s1689_s5 + $0x109] sm:$0xff] }
  0x35   : > { %1415 = vmatpush3.bf16.msra.mxu0 %v1715_v44  ;;  %1431 = vmatpush3.bf16.msra.mxu1 %v1715_v44  ;;  %v324_v59 = vadd.f32 %v1793_v23, %v256_v26  ;;  %v360_v44 = vmul.f32 %v1699_v33, %v1910_v18  ;;  %v563_v50 = vadd.f32 %v531_v41, %v495_v57 }
  0x36   : > { %1360 = vmatprep.mubr.f32.mxu1 %v870_v20  ;;  %v719_v42 = vadd.f32 %v687_v43, %v615_v45  ;;  %v480_v1 = vadd.f32 %v1743_v58, %v376_v31  ;;  %v241_v16 = vmul.f32 %v1691_v27, %v1802_v32  ;;  %v771_v17 = vmul.f32 %v1761_v4, %v1921_v5  ;;  %v1945_v20 = vld [vmem:[%s1689_s5 + $0x4a] sm:$0xff] }
  0x37   : > { %v392_v15 = vadd.f32 %v360_v44, %v324_v59  ;;  %v277_v23 = vmul.f32 %v1693_v28, %v1805_v35  ;;  %v345_v58 = vmul.f32 %v1699_v33, %v1924_v40  ;;  %v631_v41 = vadd.f32 %v599_v38, %v563_v50  ;;  %v1960_v44 = vld [vmem:[%s1689_s5 + $0x110] sm:$0xff] }
  0x38   : > { %v787_v43 = vadd.f32 %v755_v0, %v719_v42  ;;  %v839_v26 = vmul.f32 %v1727_v49, %v1927_v48  ;;  %v548_v32 = vadd.f32 %v1758_v2, %v480_v1  ;;  %v600_v57 = vmul.f32 %v1731_v53, %v1938_v11  ;;  %v1965_v42 = vld [vmem:[%s1689_s5 + $0x10a] sm:$0xff] }
  0x39   : > { %v496_v45 = vadd.f32 %v1797_v29, %v392_v15  ;;  %v309_v31 = vadd.f32 %v277_v23, %v241_v16  ;;  %v449_v59 = vmul.f32 %v1701_v34, %v1831_v62  ;;  %v735_v7 = vadd.f32 %v703_v37, %v631_v41  ;;  %v1968_v2 = vld [vmem:[%s1689_s5 + $0x51] sm:$0xff] }
  0x3a   : > { %v855_v19 = vadd.f32 %v823_v25, %v787_v43  ;;  %v616_v0 = vadd.f32 %v584_v61, %v548_v32  ;;  %v824_v38 = vmul.f32 %v1727_v49, %v1945_v20  ;;  %v517_v50 = vmul.f32 %v1721_v47, %v1852_v14  ;;  %v1991_v43 = vld [vmem:[%s1689_s5 + $0x60] sm:$0xff] }
  0x3b   : > { %v564_v29 = vadd.f32 %v1813_v39, %v496_v45  ;;  %v377_v15 = vadd.f32 %v345_v58, %v309_v31  ;;  %v257_v62 = vmul.f32 %v1691_v27, %v1841_v8  ;;  %v803_v25 = vadd.f32 %v771_v17, %v735_v7 }
  0x3c   : > { %1337 = vmatmul.mubr.f32.vlgmr.msra.gmra.mrb[0].mxu0 %v855_v19  ;;  %v720_v37 = vadd.f32 %v1774_v12, %v616_v0  ;;  %v293_v61 = vmul.f32 %v1693_v28, %v1844_v9  ;;  %v361_v1 = vmul.f32 %v1699_v33, %v1960_v44  ;;  %v840_v16 = vmul.f32 %v1727_v49, %v1965_v42  ;;  %v1986_v19 = vld [vmem:[%s1689_s5 + $0x52] sm:$0xff] }
  0x3d   : > { %v632_v39 = vadd.f32 %v600_v57, %v564_v29  ;;  %v481_v23 = vadd.f32 %v449_v59, %v377_v15  ;;  %v585_v58 = vmul.f32 %v1731_v53, %v1968_v2  ;;  %v871_v8 = vadd.f32 %v839_v26, %v803_v25  ;;  %v2011_v15 = vld [vmem:[%s1689_s5 + $0x120] sm:$0xff] }
  0x3e   : > { %v788_v7 = vadd.f32 %v1787_v21, %v720_v37  ;;  %v325_v12 = vadd.f32 %v293_v61, %v257_v62  ;;  %v465_v17 = vmul.f32 %v1701_v34, %v1874_v30  ;;  %v689_v45 = vmul.f32 %v1734_v55, %v1865_v24  ;;  %v1999_v21 = vld [vmem:[%s1689_s5 + $0x111] sm:$0xff]  ;;  %v2022_v37 = vld [vmem:[%s1689_s5 + $0x61] sm:$0xff] }
  0x3f   : > { %v736_v41 = vadd.f32 %v1823_v51, %v632_v39  ;;  %v549_v32 = vadd.f32 %v517_v50, %v481_v23  ;;  %v757_v26 = vmul.f32 %v1761_v4, %v1886_v52  ;;  %1361 = vmatmul.mubr.f32.vlgmr.msra.gmra.mrb[0].mxu1 %v871_v8  ;;  %v533_v30 = vmul.f32 %v1721_v47, %v1889_v54  ;;  %v2016_v62 = vld [vmem:[%s1689_s5 + $0x112] sm:$0xff] }
  0x40   : > { %v856_v57 = vadd.f32 %v824_v38, %v788_v7  ;;  %v393_v31 = vadd.f32 %v361_v1, %v325_v12  ;;  %v278_v51 = vmul.f32 %v1693_v28, %v1881_v46  ;;  %v825_v24 = vmul.f32 %v1727_v49, %v1986_v19 }
  0x41   : > { %v804_v59 = vadd.f32 %v1849_v10, %v736_v41  ;;  %v617_v0 = vadd.f32 %v585_v58, %v549_v32  ;;  %v346_v29 = vmul.f32 %v1699_v33, %v1991_v43  ;;  %v601_v50 = vmul.f32 %v1731_v53, %v1999_v21  ;;  %v2040_v41 = vld [vmem:[%s1689_s5 + $0x62] sm:$0xff] }
  0x42   : > { %1339 = vmatprep.mubr.f32.mxu0 %v856_v57  ;;  %v497_v38 = vadd.f32 %v465_v17, %v393_v31  ;;  %v705_v10 = vmul.f32 %v1734_v55, %v1921_v5  ;;  %v310_v25 = vadd.f32 %v278_v51, %v1737_v56  ;;  %v773_v39 = vmul.f32 %v1761_v4, %v1927_v48  ;;  %v2033_v56 = vld [vmem:[%s1689_s5 + $0x68] sm:$0xff] }
  0x43   : > { %v872_v61 = vadd.f32 %v840_v16, %v804_v59  ;;  %v721_v1 = vadd.f32 %v689_v45, %v617_v0  ;;  %v294_v23 = vmul.f32 %v1693_v28, %v1910_v18  ;;  %v518_v7 = vmul.f32 %v1721_v47, %v1907_v6  ;;  %v2045_v31 = vld [vmem:[%s1689_s5 + $0x121] sm:$0xff] }
  0x44   : > { %v565_v58 = vadd.f32 %v533_v30, %v497_v38  ;;  %v378_v8 = vadd.f32 %v346_v29, %v310_v25  ;;  %v362_v5 = vmul.f32 %v1699_v33, %v2011_v15  ;;  %v841_v12 = vmul.f32 %v1727_v49, %v2016_v62 }
  0x45   : > { %1363 = vmatprep.mubr.f32.mxu1 %v872_v61  ;;  %v789_v16 = vadd.f32 %v757_v26, %v721_v1  ;;  %v586_v17 = vmul.f32 %v1731_v53, %v2022_v37  ;;  %v326_v32 = vadd.f32 %v294_v23, %v1790_v22  ;;  %v534_v30 = vmul.f32 %v1721_v47, %v1938_v11  ;;  %v2063_v61 = vld [vmem:[%s1689_s5 + $0x69] sm:$0xff] }
  0x46   : > { %v633_v45 = vadd.f32 %v601_v50, %v565_v58  ;;  %v482_v57 = vadd.f32 %v1753_v63, %v378_v8  ;;  %v243_v26 = vmul.f32 %v1691_v27, %v1805_v35  ;;  %v279_v0 = vmul.f32 %v1693_v28, %v1924_v40  ;;  %v2068_v1 = vld [vmem:[%s1689_s5 + $0x128] sm:$0xff] }
  0x47   : > { %v857_v51 = vadd.f32 %v825_v24, %v789_v16  ;;  %v394_v59 = vadd.f32 %v362_v5, %v326_v32  ;;  %v347_v22 = vmul.f32 %v1699_v33, %v2033_v56  ;;  %v758_v38 = vmul.f32 %v1761_v4, %v1945_v20  ;;  %v2075_v5 = vld [vmem:[%s1689_s5 + $0x122] sm:$0xff] }
  0x48   : > { %v737_v29 = vadd.f32 %v705_v10, %v633_v45  ;;  %v550_v63 = vadd.f32 %v518_v7, %v482_v57  ;;  %v826_v50 = vmul.f32 %v1727_v49, %v2040_v41  ;;  %v602_v24 = vmul.f32 %v1731_v53, %v2045_v31 }
  0x49   : > { %1340 = vmatmul.mubr.f32.gmra.mrb[2].mxu0 %v857_v51  ;;  %v498_v35 = vadd.f32 %v1810_v36, %v394_v59  ;;  %v311_v25 = vadd.f32 %v279_v0, %v243_v26  ;;  %v451_v10 = vmul.f32 %v1701_v34, %v1852_v14  ;;  %v774_v8 = vmul.f32 %v1761_v4, %v1965_v42  ;;  %v2089_v59 = vld [vmem:[%s1689_s5 + $0x78] sm:$0xff] }
  0x4a   : > { %v805_v23 = vadd.f32 %v773_v39, %v737_v29  ;;  %v618_v58 = vadd.f32 %v586_v17, %v550_v63  ;;  %v519_v36 = vmul.f32 %v1721_v47, %v1968_v2  ;;  %v259_v32 = vmul.f32 %v1691_v27, %v1844_v9  ;;  %v2098_v29 = vld [vmem:[%s1689_s5 + $0x129] sm:$0xff] }
  0x4b   : > { %v566_v7 = vadd.f32 %v534_v30, %v498_v35  ;;  %v379_v16 = vadd.f32 %v347_v22, %v311_v25  ;;  %v295_v14 = vmul.f32 %v1693_v28, %v1960_v44  ;;  %v587_v45 = vmul.f32 %v1731_v53, %v2063_v61 }
  0x4c   : > { %v873_v39 = vadd.f32 %v841_v12, %v805_v23  ;;  %v722_v17 = vadd.f32 %v1777_v13, %v618_v58  ;;  %v363_v57 = vmul.f32 %v1699_v33, %v2068_v1  ;;  %v467_v9 = vmul.f32 %v1701_v34, %v1889_v54  ;;  %v2102_v54 = vld [vmem:[%s1689_s5 + $0x6a] sm:$0xff] }
  0x4d   : > { %v634_v30 = vadd.f32 %v602_v24, %v566_v7  ;;  %v483_v26 = vadd.f32 %v451_v10, %v379_v16  ;;  %v327_v51 = vadd.f32 %v295_v14, %v259_v32  ;;  %v842_v13 = vmul.f32 %v1727_v49, %v2075_v5  ;;  %v2119_v32 = vld [vmem:[%s1689_s5 + $0x138] sm:$0xff] }
  0x4e   : > { %1364 = vmatmul.mubr.f32.gmra.mrb[2].mxu1 %v873_v39  ;;  %v790_v0 = vadd.f32 %v758_v38, %v722_v17  ;;  %v691_v12 = vmul.f32 %v1734_v55, %v1886_v52  ;;  %v759_v22 = vmul.f32 %v1761_v4, %v1986_v19  ;;  %v535_v38 = vmul.f32 %v1721_v47, %v1999_v21 }
  0x4f   : > { %v738_v63 = vadd.f32 %v1834_v3, %v634_v30  ;;  %v551_v35 = vadd.f32 %v519_v36, %v483_v26  ;;  %v395_v24 = vadd.f32 %v363_v57, %v327_v51  ;;  %v244_v10 = vmul.f32 %v1691_v27, %v1881_v46  ;;  %v2127_v57 = vld [vmem:[%s1689_s5 + $0x12a] sm:$0xff] }
  0x50   : > { %v858_v25 = vadd.f32 %v826_v50, %v790_v0  ;;  %v280_v52 = vmul.f32 %v1693_v28, %v1991_v43  ;;  %v348_v3 = vmul.f32 %v1699_v33, %v2089_v59  ;;  %v603_v7 = vmul.f32 %v1731_v53, %v2098_v29 }
  0x51   : > { %v806_v23 = vadd.f32 %v774_v8, %v738_v63  ;;  %v619_v58 = vadd.f32 %v587_v45, %v551_v35  ;;  %v499_v36 = vadd.f32 %v467_v9, %v395_v24  ;;  %v827_v50 = vmul.f32 %v1727_v49, %v2102_v54  ;;  %v2124_v45 = vld [vmem:[%s1689_s5 + $0x79] sm:$0xff] }
  0x52   : > { %1342 = vmatprep.mubr.f32.mxu0 %v858_v25  ;;  %v312_v16 = vadd.f32 %v280_v52, %v244_v10  ;;  %v452_v46 = vmul.f32 %v1701_v34, %v1907_v6  ;;  %v707_v8 = vmul.f32 %v1734_v55, %v1927_v48  ;;  %v520_v26 = vmul.f32 %v1721_v47, %v2022_v37  ;;  %v2144_v24 = vld [vmem:[%s1689_s5 + $0x80] sm:$0xff] }
  0x53   : > { %v874_v14 = vadd.f32 %v842_v13, %v806_v23  ;;  %v723_v39 = vadd.f32 %v691_v12, %v619_v58  ;;  %v567_v17 = vadd.f32 %v535_v38, %v499_v36  ;;  %v260_v6 = vmul.f32 %v1691_v27, %v1910_v18  ;;  %v2149_v10 = vld [vmem:[%s1689_s5 + $0x7a] sm:$0xff] }
  0x54   : > { %v380_v30 = vadd.f32 %v348_v3, %v312_v16  ;;  %v296_v51 = vmul.f32 %v1693_v28, %v2011_v15  ;;  %v775_v0 = vmul.f32 %v1761_v4, %v2016_v62  ;;  %v364_v13 = vmul.f32 %v1699_v33, %v2119_v32  ;;  %v2154_v3 = vld [vmem:[%s1689_s5 + $0x139] sm:$0xff] }
  0x55   : > { %1366 = vmatprep.mubr.f32.mxu1 %v874_v14  ;;  %v791_v9 = vadd.f32 %v759_v22, %v723_v39  ;;  %v635_v48 = vadd.f32 %v603_v7, %v567_v17  ;;  %v588_v63 = vmul.f32 %v1731_v53, %v2124_v45  ;;  %v468_v18 = vmul.f32 %v1701_v34, %v1938_v11 }
  0x56   : > { %v484_v12 = vadd.f32 %v452_v46, %v380_v30  ;;  %v328_v35 = vadd.f32 %v296_v51, %v260_v6  ;;  %v843_v22 = vmul.f32 %v1727_v49, %v2127_v57  ;;  %v692_v52 = vmul.f32 %v1734_v55, %v1945_v20  ;;  %v2174_v30 = vld [vmem:[%s1689_s5 + $0x13a] sm:$0xff] }
  0x57   : > { %v859_v38 = vadd.f32 %v827_v50, %v791_v9  ;;  %v739_v25 = vadd.f32 %v707_v8, %v635_v48  ;;  %v536_v11 = vmul.f32 %v1721_v47, %v2045_v31  ;;  %v245_v36 = vmul.f32 %v1691_v27, %v1924_v40  ;;  %v2171_v40 = vld [vmem:[%s1689_s5 + $0x140] sm:$0xff] }
  0x58   : > { %v552_v23 = vadd.f32 %v520_v26, %v484_v12  ;;  %v396_v58 = vadd.f32 %v364_v13, %v328_v35  ;;  %v760_v50 = vmul.f32 %v1761_v4, %v2040_v41  ;;  %v281_v20 = vmul.f32 %v1693_v28, %v2033_v56  ;;  %v2179_v51 = vld [vmem:[%s1689_s5 + $0x81] sm:$0xff] }
  0x59   : > { %1343 = vmatmul.mubr.f32.gmra.mrb[4].mxu0 %v859_v38  ;;  %v807_v7 = vadd.f32 %v775_v0, %v739_v25  ;;  %v349_v16 = vmul.f32 %v1699_v33, %v2144_v24  ;;  %v828_v14 = vmul.f32 %v1727_v49, %v2149_v10  ;;  %v604_v17 = vmul.f32 %v1731_v53, %v2154_v3 }
  0x5a   : > { %v620_v46 = vadd.f32 %v588_v63, %v552_v23  ;;  %v500_v39 = vadd.f32 %v468_v18, %v396_v58  ;;  %v708_v26 = vmul.f32 %v1734_v55, %v1965_v42  ;;  %v313_v6 = vadd.f32 %v281_v20, %v245_v36  ;;  %v2201_v23 = vld [vmem:[%s1689_s5 + $0x82] sm:$0xff] }
  0x5b   : > { %v875_v8 = vadd.f32 %v843_v22, %v807_v7  ;;  %v453_v9 = vmul.f32 %v1701_v34, %v1968_v2  ;;  %v776_v13 = vmul.f32 %v1761_v4, %v2075_v5  ;;  %v261_v12 = vmul.f32 %v1691_v27, %v1960_v44  ;;  %v2198_v44 = vld [vmem:[%s1689_s5 + $0x90] sm:$0xff]  ;;  %v2206_v36 = vld [vmem:[%s1689_s5 + $0x141] sm:$0xff] }
  0x5c   : > { %v724_v48 = vadd.f32 %v692_v52, %v620_v46  ;;  %v568_v0 = vadd.f32 %v536_v11, %v500_v39  ;;  %v381_v63 = vadd.f32 %v349_v16, %v313_v6  ;;  %v521_v42 = vmul.f32 %v1721_v47, %v2063_v61 }
  0x5d   : > { %1367 = vmatmul.mubr.f32.gmra.mrb[4].mxu1 %v875_v8  ;;  %v297_v35 = vmul.f32 %v1693_v28, %v2068_v1  ;;  %v365_v2 = vmul.f32 %v1699_v33, %v2171_v40  ;;  %v844_v25 = vmul.f32 %v1727_v49, %v2174_v30  ;;  %v589_v22 = vmul.f32 %v1731_v53, %v2179_v51 }
  0x5e   : > { %v792_v18 = vadd.f32 %v760_v50, %v724_v48  ;;  %v636_v38 = vadd.f32 %v604_v17, %v568_v0  ;;  %v485_v52 = vadd.f32 %v453_v9, %v381_v63  ;;  %v693_v58 = vmul.f32 %v1734_v55, %v1986_v19  ;;  %v2225_v0 = vld [vmem:[%s1689_s5 + $0x91] sm:$0xff] }
  0x5f   : > { %v329_v11 = vadd.f32 %v297_v35, %v261_v12  ;;  %v469_v7 = vmul.f32 %v1701_v34, %v1999_v21  ;;  %v537_v16 = vmul.f32 %v1721_v47, %v2098_v29  ;;  %v246_v46 = vmul.f32 %v1691_v27, %v1991_v43  ;;  %v2230_v63 = vld [vmem:[%s1689_s5 + $0x150] sm:$0xff] }
  0x60   : > { %v860_v50 = vadd.f32 %v828_v14, %v792_v18  ;;  %v740_v20 = vadd.f32 %v708_v26, %v636_v38  ;;  %v553_v39 = vadd.f32 %v521_v42, %v485_v52  ;;  %v282_v19 = vmul.f32 %v1693_v28, %v2089_v59 }
  0x61   : > { %v397_v17 = vadd.f32 %v365_v2, %v329_v11  ;;  %v350_v8 = vmul.f32 %v1699_v33, %v2198_v44  ;;  %v761_v14 = vmul.f32 %v1761_v4, %v2102_v54  ;;  %v829_v26 = vmul.f32 %v1727_v49, %v2201_v23 }
  0x62   : > { %1345 = vmatprep.mubr.f32.mxu0 %v860_v50  ;;  %v808_v21 = vadd.f32 %v776_v13, %v740_v20  ;;  %v605_v43 = vmul.f32 %v1731_v53, %v2206_v36  ;;  %v621_v6 = vadd.f32 %v589_v22, %v553_v39  ;;  %v314_v48 = vadd.f32 %v282_v19, %v246_v46  ;;  %v2239_v22 = vld [vmem:[%s1689_s5 + $0x142] sm:$0xff]  ;;  %v2252_v20 = vld [vmem:[%s1689_s5 + $0x92] sm:$0xff] }
  0x63   : > { %v501_v9 = vadd.f32 %v469_v7, %v397_v17  ;;  %v454_v12 = vmul.f32 %v1701_v34, %v2022_v37  ;;  %v709_v42 = vmul.f32 %v1734_v55, %v2016_v62  ;;  %v522_v35 = vmul.f32 %v1721_v47, %v2124_v45  ;;  %v2255_v46 = vld [vmem:[%s1689_s5 + $0x98] sm:$0xff] }
  0x64   : > { %v876_v13 = vadd.f32 %v844_v25, %v808_v21  ;;  %v262_v2 = vmul.f32 %v1691_v27, %v2011_v15  ;;  %v725_v18 = vadd.f32 %v693_v58, %v621_v6  ;;  %v382_v37 = vadd.f32 %v350_v8, %v314_v48  ;;  %v2262_v19 = vld [vmem:[%s1689_s5 + $0x151] sm:$0xff] }
  0x65   : > { %v569_v38 = vadd.f32 %v537_v16, %v501_v9  ;;  %v298_v25 = vmul.f32 %v1693_v28, %v2119_v32  ;;  %v777_v62 = vmul.f32 %v1761_v4, %v2127_v57  ;;  %v590_v52 = vmul.f32 %v1731_v53, %v2225_v0 }
  0x66   : > { %1369 = vmatprep.mubr.f32.mxu1 %v876_v13  ;;  %v366_v15 = vmul.f32 %v1699_v33, %v2230_v63  ;;  %v470_v58 = vmul.f32 %v1701_v34, %v2045_v31  ;;  %v793_v11 = vadd.f32 %v761_v14, %v725_v18  ;;  %v486_v50 = vadd.f32 %v454_v12, %v382_v37 }
  0x67   : > { %v637_v7 = vadd.f32 %v605_v43, %v569_v38  ;;  %v330_v16 = vadd.f32 %v298_v25, %v262_v2  ;;  %v845_v39 = vmul.f32 %v1727_v49, %v2239_v22  ;;  %v694_v17 = vmul.f32 %v1734_v55, %v2040_v41  ;;  %v2282_v2 = vld [vmem:[%s1689_s5 + $0x152] sm:$0xff] }
  0x68   : > { %v538_v31 = vmul.f32 %v1721_v47, %v2154_v3  ;;  %v247_v8 = vmul.f32 %v1691_v27, %v2033_v56  ;;  %v861_v21 = vadd.f32 %v829_v26, %v793_v11  ;;  %v554_v43 = vadd.f32 %v522_v35, %v486_v50  ;;  %v2279_v35 = vld [vmem:[%s1689_s5 + $0x158] sm:$0xff] }
  0x69   : > { %v741_v14 = vadd.f32 %v709_v42, %v637_v7  ;;  %v398_v6 = vadd.f32 %v366_v15, %v330_v16  ;;  %v762_v9 = vmul.f32 %v1761_v4, %v2149_v10  ;;  %v830_v41 = vmul.f32 %v1727_v49, %v2252_v20  ;;  %v2289_v25 = vld [vmem:[%s1689_s5 + $0x99] sm:$0xff] }
  0x6a   : > { %v283_v48 = vmul.f32 %v1693_v28, %v2144_v24  ;;  %v351_v12 = vmul.f32 %v1699_v33, %v2255_v46  ;;  %1346 = vmatmul.mubr.f32.gmra.mrb[6].mxu0 %v861_v21  ;;  %v622_v56 = vadd.f32 %v590_v52, %v554_v43  ;;  %v606_v42 = vmul.f32 %v1731_v53, %v2262_v19  ;;  %v2309_v21 = vld [vmem:[%s1689_s5 + $0x9a] sm:$0xff] }
  0x6b   : > { %v809_v13 = vadd.f32 %v777_v62, %v741_v14  ;;  %v502_v26 = vadd.f32 %v470_v58, %v398_v6  ;;  %v710_v18 = vmul.f32 %v1734_v55, %v2075_v5  ;;  %v778_v38 = vmul.f32 %v1761_v4, %v2174_v30  ;;  %v2314_v6 = vld [vmem:[%s1689_s5 + $0x159] sm:$0xff] }
  0x6c   : > { %v315_v37 = vadd.f32 %v283_v48, %v247_v8  ;;  %v455_v62 = vmul.f32 %v1701_v34, %v2063_v61  ;;  %v726_v15 = vadd.f32 %v694_v17, %v622_v56  ;;  %v263_v11 = vmul.f32 %v1691_v27, %v2068_v1  ;;  %v2306_v1 = vld [vmem:[%s1689_s5 + $0xa8] sm:$0xff] }
  0x6d   : > { %v877_v52 = vadd.f32 %v845_v39, %v809_v13  ;;  %v570_v58 = vadd.f32 %v538_v31, %v502_v26  ;;  %v523_v5 = vmul.f32 %v1721_v47, %v2179_v51  ;;  %v299_v50 = vmul.f32 %v1693_v28, %v2171_v40 }
  0x6e   : > { %v383_v7 = vadd.f32 %v351_v12, %v315_v37  ;;  %v367_v16 = vmul.f32 %v1699_v33, %v2279_v35  ;;  %v794_v61 = vadd.f32 %v762_v9, %v726_v15  ;;  %v846_v39 = vmul.f32 %v1727_v49, %v2282_v2 }
  0x6f   : > { %1370 = vmatmul.mubr.f32.gmra.mrb[6].mxu1 %v877_v52  ;;  %v638_v8 = vadd.f32 %v606_v42, %v570_v58  ;;  %v591_v17 = vmul.f32 %v1731_v53, %v2289_v25  ;;  %v695_v14 = vmul.f32 %v1734_v55, %v2102_v54  ;;  %v331_v43 = vadd.f32 %v299_v50, %v263_v11  ;;  %v2333_v58 = vld [vmem:[%s1689_s5 + $0xa9] sm:$0xff] }
  0x70   : > { %v487_v31 = vadd.f32 %v455_v62, %v383_v7  ;;  %v471_v9 = vmul.f32 %v1701_v34, %v2098_v29  ;;  %v862_v48 = vadd.f32 %v830_v41, %v794_v61  ;;  %v539_v13 = vmul.f32 %v1721_v47, %v2206_v36  ;;  %v2338_v7 = vld [vmem:[%s1689_s5 + $0x168] sm:$0xff] }
  0x71   : > { %v742_v12 = vadd.f32 %v710_v18, %v638_v8  ;;  %v248_v56 = vmul.f32 %v1691_v27, %v2089_v59  ;;  %v399_v42 = vadd.f32 %v367_v16, %v331_v43  ;;  %v284_v54 = vmul.f32 %v1693_v28, %v2198_v44 }
  0x72   : > { %v555_v26 = vadd.f32 %v523_v5, %v487_v31  ;;  %v352_v37 = vmul.f32 %v1699_v33, %v2306_v1  ;;  %1348 = vmatprep.mubr.f32.mxu0 %v862_v48  ;;  %v763_v41 = vmul.f32 %v1761_v4, %v2201_v23  ;;  %v831_v18 = vmul.f32 %v1727_v49, %v2309_v21 }
  0x73   : > { %v810_v29 = vadd.f32 %v778_v38, %v742_v12  ;;  %v607_v59 = vmul.f32 %v1731_v53, %v2314_v6  ;;  %v503_v52 = vadd.f32 %v471_v9, %v399_v42  ;;  %v316_v15 = vadd.f32 %v284_v54, %v248_v56  ;;  %v2360_v12 = vld [vmem:[%s1689_s5 + $0xaa] sm:$0xff] }
  0x74   : > { %v623_v62 = vadd.f32 %v591_v17, %v555_v26  ;;  %v456_v11 = vmul.f32 %v1701_v34, %v2124_v45  ;;  %v711_v5 = vmul.f32 %v1734_v55, %v2127_v57  ;;  %v524_v50 = vmul.f32 %v1721_v47, %v2225_v0  ;;  %v2347_v17 = vld [vmem:[%s1689_s5 + $0x15a] sm:$0xff]  ;;  %v2363_v56 = vld [vmem:[%s1689_s5 + $0xb0] sm:$0xff] }
  0x75   : > { %v878_v38 = vadd.f32 %v846_v39, %v810_v29  ;;  %v264_v16 = vmul.f32 %v1691_v27, %v2119_v32  ;;  %v571_v8 = vadd.f32 %v539_v13, %v503_v52  ;;  %v384_v45 = vadd.f32 %v352_v37, %v316_v15  ;;  %v2370_v54 = vld [vmem:[%s1689_s5 + $0x169] sm:$0xff] }
  0x76   : > { %v727_v61 = vadd.f32 %v695_v14, %v623_v62  ;;  %v300_v39 = vmul.f32 %v1693_v28, %v2230_v63  ;;  %v779_v57 = vmul.f32 %v1761_v4, %v2239_v22  ;;  %v592_v31 = vmul.f32 %v1731_v53, %v2333_v58 }
  0x77   : > { %1372 = vmatprep.mubr.f32.mxu1 %v878_v38  ;;  %v368_v32 = vmul.f32 %v1699_v33, %v2338_v7  ;;  %v472_v14 = vmul.f32 %v1701_v34, %v2154_v3  ;;  %v639_v9 = vadd.f32 %v607_v59, %v571_v8  ;;  %v488_v48 = vadd.f32 %v456_v11, %v384_v45 }
  0x78   : > { %v795_v43 = vadd.f32 %v763_v41, %v727_v61  ;;  %v332_v13 = vadd.f32 %v300_v39, %v264_v16  ;;  %v847_v26 = vmul.f32 %v1727_v49, %v2347_v17  ;;  %v696_v42 = vmul.f32 %v1734_v55, %v2149_v10  ;;  %v2390_v16 = vld [vmem:[%s1689_s5 + $0x16a] sm:$0xff] }
  0x79   : > { %v540_v3 = vmul.f32 %v1721_v47, %v2262_v19  ;;  %v249_v37 = vmul.f32 %v1691_v27, %v2144_v24  ;;  %v743_v41 = vadd.f32 %v711_v5, %v639_v9  ;;  %v556_v59 = vadd.f32 %v524_v50, %v488_v48  ;;  %v2387_v50 = vld [vmem:[%s1689_s5 + $0x170] sm:$0xff] }
  0x7a   : > { %v863_v29 = vadd.f32 %v831_v18, %v795_v43  ;;  %v400_v62 = vadd.f32 %v368_v32, %v332_v13  ;;  %v764_v52 = vmul.f32 %v1761_v4, %v2252_v20  ;;  %v832_v10 = vmul.f32 %v1727_v49, %v2360_v12  ;;  %v2397_v39 = vld [vmem:[%s1689_s5 + $0xb1] sm:$0xff] }
  0x7b   : > { %v285_v15 = vmul.f32 %v1693_v28, %v2255_v46  ;;  %v353_v11 = vmul.f32 %v1699_v33, %v2363_v56  ;;  %v811_v38 = vadd.f32 %v779_v57, %v743_v41  ;;  %v624_v24 = vadd.f32 %v592_v31, %v556_v59  ;;  %v2419_v59 = vld [vmem:[%s1689_s5 + $0x171] sm:$0xff] }
  0x7c   : > { %1349 = vmatmul.mubr.f32.gmra.mrb[8].mxu0 %v863_v29  ;;  %v504_v18 = vadd.f32 %v472_v14, %v400_v62  ;;  %v608_v5 = vmul.f32 %v1731_v53, %v2370_v54  ;;  %v712_v61 = vmul.f32 %v1734_v55, %v2174_v30  ;;  %v780_v8 = vmul.f32 %v1761_v4, %v2282_v2 }
  0x7d   : > { %v317_v45 = vadd.f32 %v285_v15, %v249_v37  ;;  %v457_v57 = vmul.f32 %v1701_v34, %v2179_v51  ;;  %v879_v31 = vadd.f32 %v847_v26, %v811_v38  ;;  %v728_v32 = vadd.f32 %v696_v42, %v624_v24 }
  0x7e   : > { %v572_v14 = vadd.f32 %v540_v3, %v504_v18  ;;  %v265_v43 = vmul.f32 %v1691_v27, %v2171_v40  ;;  %v525_v30 = vmul.f32 %v1721_v47, %v2289_v25  ;;  %v301_v48 = vmul.f32 %v1693_v28, %v2279_v35  ;;  %v2414_v3 = vld [vmem:[%s1689_s5 + $0xb2] sm:$0xff] }
  0x7f   : > { %v385_v9 = vadd.f32 %v353_v11, %v317_v45  ;;  %v369_v13 = vmul.f32 %v1699_v33, %v2387_v50  ;;  %1373 = vmatmul.mubr.f32.gmra.mrb[8].mxu1 %v879_v31  ;;  %v796_v37 = vadd.f32 %v764_v52, %v728_v32  ;;  %v848_v26 = vmul.f32 %v1727_v49, %v2390_v16  ;;  %v2445_v31 = vld [vmem:[%s1689_s5 + $0x180] sm:$0xff] }
  0x80   : > { %v640_v51 = vadd.f32 %v608_v5, %v572_v14  ;;  %v593_v42 = vmul.f32 %v1731_v53, %v2397_v39  ;;  %v697_v29 = vmul.f32 %v1734_v55, %v2201_v23  ;;  %v333_v41 = vadd.f32 %v301_v48, %v265_v43 }
  0x81   : > { %v489_v40 = vadd.f32 %v457_v57, %v385_v9  ;;  %v473_v62 = vmul.f32 %v1701_v34, %v2206_v36  ;;  %v864_v52 = vadd.f32 %v832_v10, %v796_v37  ;;  %v541_v49 = vmul.f32 %v1721_v47, %v2314_v6  ;;  %v2436_v10 = vld [vmem:[%s2740_s1 + $0x8] ss:$0 sm:$0xff] }
  0x82   : > { %v744_v15 = vadd.f32 %v712_v61, %v640_v51  ;;  %v250_v11 = vmul.f32 %v1691_v27, %v2198_v44  ;;  %v401_v24 = vadd.f32 %v369_v13, %v333_v41  ;;  %v286_v23 = vmul.f32 %v1693_v28, %v2306_v1  ;;  %v2454_v13 = vld [vmem:[%s1689_s5 + $0x172] sm:$0xff] }
  0x83   : > { %v557_v38 = vadd.f32 %v525_v30, %v489_v40  ;;  %v354_v18 = vmul.f32 %v1699_v33, %v1747_v60  ;;  %1351 = vmatprep.mubr.f32.mxu0 %v864_v52  ;;  %v765_v36 = vmul.f32 %v1761_v4, %v2309_v21  ;;  %v833_v44 = vmul.f32 %v2436_v10, %v2414_v3 }
  0x84   : > { %v812_v5 = vadd.f32 %v780_v8, %v744_v15  ;;  %v609_v61 = vmul.f32 %v1731_v53, %v2419_v59  ;;  %v505_v60 = vadd.f32 %v473_v62, %v401_v24  ;;  %v318_v57 = vadd.f32 %v286_v23, %v250_v11 }
  0x85   : > { %v625_v45 = vadd.f32 %v593_v42, %v557_v38  ;;  %v458_v8 = vmul.f32 %v1701_v34, %v2225_v0  ;;  %v713_v14 = vmul.f32 %v1734_v55, %v2239_v22  ;;  %v526_v43 = vmul.f32 %v1721_v47, %v2333_v58  ;;  %v2461_v22 = vld [vmem:[%s1689_s5 + $0xc1] sm:$0xff] }
  0x86   : > { %v880_v32 = vadd.f32 %v848_v26, %v812_v5  ;;  %v266_v9 = vmul.f32 %v1691_v27, %v2230_v63  ;;  %v573_v48 = vadd.f32 %v541_v49, %v505_v60  ;;  %v386_v37 = vadd.f32 %v354_v18, %v318_v57  ;;  %v2474_v49 = vld [vmem:[%s1689_s5 + $0x181] sm:$0xff] }
  0x87   : > { %v729_v30 = vadd.f32 %v697_v29, %v625_v45  ;;  %v302_v0 = vmul.f32 %v1693_v28, %v2338_v7  ;;  %v781_v51 = vmul.f32 %v1761_v4, %v2347_v17  ;;  %v594_v26 = vmul.f32 %v2461_v22, %v1731_v53  ;;  %v2752_v45 = vld [vmem:[#allocation5_spill] sm:$0xff] }
  0x88   : > { %1375 = vmatprep.mubr.f32.mxu1 %v880_v32  ;;  %v370_v63 = vmul.f32 %v1699_v33, %v2445_v31  ;;  %v474_v42 = vmul.f32 %v1701_v34, %v2262_v19  ;;  %v641_v29 = vadd.f32 %v609_v61, %v573_v48  ;;  %v490_v41 = vadd.f32 %v458_v8, %v386_v37  ;;  %v2494_v32 = vld [vmem:[%s1689_s5 + $0x188] sm:$0xff] }
  0x89   : > { %v797_v40 = vadd.f32 %v765_v36, %v729_v30  ;;  %v334_v62 = vadd.f32 %v302_v0, %v266_v9  ;;  %v849_v52 = vmul.f32 %v2436_v10, %v2454_v13  ;;  %v698_v15 = vmul.f32 %v1734_v55, %v2252_v20  ;;  %v2483_v36 = vld [vmem:[%s1689_s5 + $0xc2] sm:$0xff] }
  0x8a   : > { %v542_v11 = vmul.f32 %v1721_v47, %v2370_v54  ;;  %v251_v38 = vmul.f32 %v1691_v27, %v2255_v46  ;;  %v745_v24 = vadd.f32 %v713_v14, %v641_v29  ;;  %v558_v23 = vadd.f32 %v526_v43, %v490_v41  ;;  %v2497_v14 = vld [vmem:[%s1689_s5 + $0x182] sm:$0xff] }
  0x8b   : > { %v865_v19 = vadd.f32 %v833_v44, %v797_v40  ;;  %v402_v18 = vadd.f32 %v370_v63, %v334_v62  ;;  %v766_v5 = vmul.f32 %v1761_v4, %v2360_v12  ;;  %v834_v20 = vmul.f32 %v2483_v36, %v2436_v10  ;;  %v2753_v62 = vld [vmem:[#allocation6_spill] sm:$0xff] }
  0x8c   : > { %v287_v61 = vmul.f32 %v1693_v28, %v2363_v56  ;;  %v355_v60 = vmul.f32 %v1699_v33, %v2752_v45  ;;  %v813_v46 = vadd.f32 %v781_v51, %v745_v24  ;;  %v626_v44 = vadd.f32 %v594_v26, %v558_v23 }
  0x8d   : > { %1352 = vmatmul.mubr.f32.gmra.mrb[10].mxu0 %v865_v19  ;;  %v506_v57 = vadd.f32 %v474_v42, %v402_v18  ;;  %v610_v8 = vmul.f32 %v1731_v53, %v2474_v49  ;;  %v714_v43 = vmul.f32 %v1734_v55, %v2282_v2  ;;  %v782_v9 = vmul.f32 %v1761_v4, %v2390_v16 }
  0x8e   : > { %v319_v30 = vadd.f32 %v287_v61, %v251_v38  ;;  %v459_v48 = vmul.f32 %v1701_v34, %v2289_v25  ;;  %v881_v37 = vadd.f32 %v849_v52, %v813_v46  ;;  %v730_v0 = vadd.f32 %v698_v15, %v626_v44  ;;  %v2520_v38 = vld [vmem:[%s1689_s5 + $0x189] sm:$0xff]  ;;  %v1478_v46 = vld [vmem:[%s1689_s5 + $0xd8] sm:$0xff] }
  0x8f   : > { %v574_v51 = vadd.f32 %v542_v11, %v506_v57  ;;  %v267_v26 = vmul.f32 %v1691_v27, %v2279_v35  ;;  %v527_v42 = vmul.f32 %v1721_v47, %v2397_v39  ;;  %v303_v2 = vmul.f32 %v1693_v28, %v2387_v50  ;;  %v2754_v57 = vld [vmem:[#allocation7_spill] sm:$0xff] }
  0x90   : > { %v387_v63 = vadd.f32 %v355_v60, %v319_v30  ;;  %v371_v40 = vmul.f32 %v1699_v33, %v2494_v32  ;;  %1376 = vmatmul.mubr.f32.gmra.mrb[10].mxu1 %v881_v37  ;;  %v798_v25 = vadd.f32 %v766_v5, %v730_v0  ;;  %v850_v41 = vmul.f32 %v2436_v10, %v2497_v14  ;;  %v1477_v60 = vld [vmem:[%s1689_s5 + $0xc0] sm:$0xff]  ;;  %v232_v0 = vld [vmem:[%s1689_s5 + $0x198] sm:$0xff] }
  0x91   : > { %v642_v29 = vadd.f32 %v610_v8, %v574_v51  ;;  %v595_v35 = vmul.f32 %v1731_v53, %v2753_v62  ;;  %v699_v15 = vmul.f32 %v1734_v55, %v2309_v21  ;;  %v335_v11 = vadd.f32 %v303_v2, %v267_v26 }
  0x92   : > { %v491_v52 = vadd.f32 %v459_v48, %v387_v63  ;;  %v475_v19 = vmul.f32 %v1701_v34, %v2314_v6  ;;  %v866_v24 = vadd.f32 %v834_v20, %v798_v25  ;;  %v543_v18 = vmul.f32 %v1721_v47, %v2419_v59 }
  0x93   : > { %v746_v23 = vadd.f32 %v714_v43, %v642_v29  ;;  %v252_v5 = vmul.f32 %v1691_v27, %v2306_v1  ;;  %v403_v45 = vadd.f32 %v371_v40, %v335_v11  ;;  %v288_v21 = vmul.f32 %v1477_v60, %v1693_v28  ;;  %v2548_v40 = vld [vmem:[%s1689_s5 + $0x18a] sm:$0xff] }
  0x94   : > { %v559_v61 = vadd.f32 %v527_v42, %v491_v52  ;;  %v356_v44 = vmul.f32 %v1478_v46, %v1699_v33  ;;  %1354 = vmatprep.mubr.f32.mxu0 %v866_v24  ;;  %v767_v20 = vmul.f32 %v1761_v4, %v2414_v3  ;;  %v835_v8 = vmul.f32 %v2436_v10, %v2754_v57  ;;  %v1480_v60 = vld [vmem:[%s1689_s5 + $0xc8] sm:$0xff]  ;;  %v1482_v57 = vld [vmem:[%s1689_s5 + $0xda] sm:$0xff] }
  0x95   : > { %v814_v6 = vadd.f32 %v782_v9, %v746_v23  ;;  %v611_v1 = vmul.f32 %v1731_v53, %v2520_v38  ;;  %v507_v30 = vadd.f32 %v475_v19, %v403_v45  ;;  %v320_v48 = vadd.f32 %v288_v21, %v252_v5  ;;  %v440_v19 = vld [vmem:[%s1689_s5 + $0x199] sm:$0xff] }
  0x96   : > { %v627_v43 = vadd.f32 %v595_v35, %v559_v61  ;;  %v460_v37 = vmul.f32 %v1701_v34, %v2333_v58  ;;  %v715_v9 = vmul.f32 %v1734_v55, %v2347_v17  ;;  %v528_v26 = vmul.f32 %v2461_v22, %v1721_v47  ;;  %v1479_v17 = vld [vmem:[%s1689_s5 + $0xd9] sm:$0xff] }
  0x97   : > { %v882_v51 = vadd.f32 %v850_v41, %v814_v6  ;;  %v268_v63 = vmul.f32 %v1691_v27, %v2338_v7  ;;  %v575_v2 = vadd.f32 %v543_v18, %v507_v30  ;;  %v388_v25 = vadd.f32 %v356_v44, %v320_v48 }
  0x98   : > { %v731_v42 = vadd.f32 %v699_v15, %v627_v43  ;;  %v304_v58 = vmul.f32 %v1693_v28, %v2445_v31  ;;  %v783_v29 = vmul.f32 %v1761_v4, %v2454_v13  ;;  %v596_v41 = vmul.f32 %v1479_v17, %v1731_v53 }
  0x99   : > { %1378 = vmatprep.mubr.f32.mxu1 %v882_v51  ;;  %v372_v22 = vmul.f32 %v1699_v33, %v232_v0  ;;  %v476_v7 = vmul.f32 %v1701_v34, %v2370_v54  ;;  %v643_v35 = vadd.f32 %v611_v1, %v575_v2  ;;  %v492_v52 = vadd.f32 %v460_v37, %v388_v25  ;;  %v680_v51 = vld [vmem:[%s1689_s5 + $0x19a] sm:$0xff] }
  0x9a   : > { %v799_v62 = vadd.f32 %v767_v20, %v731_v42  ;;  %v336_v15 = vadd.f32 %v304_v58, %v268_v63  ;;  %v851_v31 = vmul.f32 %v2436_v10, %v2548_v40  ;;  %v700_v11 = vmul.f32 %v1734_v55, %v2360_v12  ;;  %v1481_v12 = vld [vmem:[%s1689_s5 + $0xe0] sm:$0xff] }
  0x9b   : > { %v544_v24 = vmul.f32 %v1721_v47, %v2474_v49  ;;  %v253_v23 = vmul.f32 %v1691_v27, %v2363_v56  ;;  %v747_v18 = vadd.f32 %v715_v9, %v643_v35  ;;  %v560_v5 = vadd.f32 %v528_v26, %v492_v52  ;;  %v233_v20 = vld [vmem:[%s1689_s5 + $0x1a0] sm:$0xff]  ;;  %v1483_v26 = vld [vmem:[%s1689_s5 + $0xc9] sm:$0xff] }
  0x9c   : > { %v867_v54 = vadd.f32 %v835_v8, %v799_v62  ;;  %v404_v61 = vadd.f32 %v372_v22, %v336_v15  ;;  %v768_v45 = vmul.f32 %v2483_v36, %v1761_v4  ;;  %v289_v21 = vmul.f32 %v1480_v60, %v1693_v28  ;;  %v1485_v15 = vld [vmem:[%s1689_s5 + $0xca] sm:$0xff] }
  0x9d   : > { %v357_v46 = vmul.f32 %v1481_v12, %v1699_v33  ;;  %v815_v49 = vadd.f32 %v783_v29, %v747_v18  ;;  %v628_v44 = vadd.f32 %v596_v41, %v560_v5  ;;  %v612_v6 = vmul.f32 %v1731_v53, %v440_v19 }
  0x9e   : > { %1355 = vmatmul.mubr.f32.gmra.mrb[12].mxu0 %v867_v54  ;;  %v508_v56 = vadd.f32 %v476_v7, %v404_v61  ;;  %v836_v8 = vmul.f32 %v1482_v57, %v2436_v10  ;;  %v716_v36 = vmul.f32 %v1734_v55, %v2390_v16  ;;  %v321_v1 = vadd.f32 %v289_v21, %v253_v23 }
  0x9f   : > { %v461_v43 = vmul.f32 %v1701_v34, %v2397_v39  ;;  %v883_v30 = vadd.f32 %v851_v31, %v815_v49  ;;  %v732_v48 = vadd.f32 %v700_v11, %v628_v44  ;;  %v269_v0 = vmul.f32 %v1691_v27, %v2387_v50  ;;  %v1484_v27 = vld [vmem:[%s1689_s5 + $0xe1] sm:$0xff] }
  0xa0   : > { %v576_v37 = vadd.f32 %v544_v24, %v508_v56  ;;  %v389_v9 = vadd.f32 %v357_v46, %v321_v1  ;;  %v529_v63 = vmul.f32 %v1483_v26, %v1721_v47  ;;  %v305_v16 = vmul.f32 %v1693_v28, %v2494_v32  ;;  %v1486_v24 = vld [vmem:[%s1689_s5 + $0xe2] sm:$0xff] }
  0xa1   : > { %v373_v42 = vmul.f32 %v1699_v33, %v233_v20  ;;  %1379 = vmatmul.mubr.f32.gmra.mrb[12].mxu1 %v883_v30  ;;  %v800_v39 = vadd.f32 %v768_v45, %v732_v48  ;;  %v784_v25 = vmul.f32 %v1761_v4, %v2497_v14  ;;  %v597_v50 = vmul.f32 %v1484_v27, %v1731_v53  ;;  %v441_v33 = vld [vmem:[%s1689_s5 + $0x1a1] sm:$0xff] }
  0xa2   : > { %v644_v2 = vadd.f32 %v612_v6, %v576_v37  ;;  %v493_v58 = vadd.f32 %v461_v43, %v389_v9  ;;  %v337_v29 = vadd.f32 %v305_v16, %v269_v0  ;;  %v477_v17 = vmul.f32 %v1701_v34, %v2419_v59 }
  0xa3   : > { %v868_v41 = vadd.f32 %v836_v8, %v800_v39  ;;  %v852_v28 = vmul.f32 %v2436_v10, %v680_v51  ;;  %v701_v7 = vmul.f32 %v1734_v55, %v2414_v3  ;;  %v545_v62 = vmul.f32 %v1721_v47, %v2520_v38  ;;  %v681_v38 = vld [vmem:[%s1689_s5 + $0x1a2] sm:$0xff]  ;;  %s1491_s5 = sshll.u32 %s1551_s30, 4  ;;  %s1492_s5 = int_to_ptr.vmem [resolvable:$false] %s1491_s5 }
  0xa4   : > { %v748_v22 = vadd.f32 %v716_v36, %v644_v2  ;;  %v561_v32 = vadd.f32 %v529_v63, %v493_v58  ;;  %v405_v14 = vadd.f32 %v373_v42, %v337_v29  ;;  %v769_v34 = vmul.f32 %v1485_v15, %v1761_v4  ;;  %s1493_s6 = scalar_lea.vmem %s1492_s5, 8192  ;;  %p1494_p0 = scmp.lt.s32.totalorder %s2691_s22, %s1492_s5 }
  0xa5   : > { %1357 = vmatprep.mubr.f32.mxu0 %v868_v41  ;;  %v613_v31 = vmul.f32 %v1731_v53, %v441_v33  ;;  %v837_v3 = vmul.f32 %v1486_v24, %v2436_v10  ;;  %v717_v47 = vmul.f32 %v1734_v55, %v2454_v13  ;;  %v785_v5 = vmul.f32 %v1761_v4, %v2548_v40  ;;  %v2619_v55 = vld [vmem:[%s2742_s3] ss:$0 sm:$0xff]  ;;  %p1495_p1 = scmp.lt.s32.totalorder %s1493_s6, %s1487_s29 }
  0xa6   : > { %v816_v35 = vadd.f32 %v784_v25, %v748_v22  ;;  %v629_v52 = vadd.f32 %v597_v50, %v561_v32  ;;  %v509_v59 = vadd.f32 %v477_v17, %v405_v14  ;;  %v853_v45 = vmul.f32 %v2436_v10, %v681_v38 }
  0xa7   : > { %p1496_p2 = por %p1495_p1, %p1494_p0 }
  0xa8   : > { %v884_v11 = vadd.f32 %v852_v28, %v816_v35  ;;  %v733_v19 = vadd.f32 %v701_v7, %v629_v52  ;;  %v577_v23 = vadd.f32 %v545_v62, %v509_v59 }
  0xa9   : > { %p1497_p3 = pnand %p1496_p2, %p1490_p13 }
  0xaa   : > { %1381 = vmatprep.mubr.f32.mxu1 %v884_v11  ;;  %v801_v54 = vadd.f32 %v769_v34, %v733_v19  ;;  %v645_v18 = vadd.f32 %v613_v31, %v577_v23 }
  0xac   : > { %v869_v61 = vadd.f32 %v837_v3, %v801_v54  ;;  %v749_v53 = vadd.f32 %v717_v47, %v645_v18 }
  0xae   : > { %1358 = vmatmul.mubr.f32.gmra.mrb[14].mxu0 %v869_v61  ;;  %v817_v60 = vadd.f32 %v785_v5, %v749_v53 }
  0xb0   : > { %v885_v21 = vadd.f32 %v853_v45, %v817_v60 }
  0xb2   : > { %1382 = vmatmul.mubr.f32.gmra.mrb[14].mxu1 %v885_v21 }
 0x10f   : > { %v1338_v13 = vpop.f32.mrb[0].mxu0 }
 0x110   : > { %v981_v12 = vadd.f32 %v1338_v13, %v2619_v55  ;;  %v975_v4 = vpop.f32.mrb[1].mxu0 }
 0x111   : > { %v976_v40 = vadd.f32 %v2619_v55, %v975_v4 }
 0x112   : > { %1135 = vst [vmem:[%s2623_s13 + $0x8] sm:$0xff] %v981_v12  ;;  %v1362_v10 = vpop.f32.mrb[0].mxu1 }
 0x113   : > { %1134 = vst [vmem:[%s2623_s13] sm:$0xff] %v976_v40  ;;  %v1061_v46 = vadd.f32 %v1362_v10, %v2619_v55  ;;  %v1055_v49 = vpop.f32.mrb[1].mxu1 }
 0x114   : > { %v1056_v44 = vadd.f32 %v2619_v55, %v1055_v49 }
 0x115   : > { %1151 = vst [vmem:[%s2623_s13 + $0x88] sm:$0xff] %v1061_v46 }
 0x116   : > { %1150 = vst [vmem:[%s2623_s13 + $0x80] sm:$0xff] %v1056_v44 }
 0x11c   : > { %v1341_v56 = vpop.f32.mrb[2].mxu0 }
 0x11d   : > { %v991_v6 = vadd.f32 %v1341_v56, %v2619_v55  ;;  %v985_v20 = vpop.f32.mrb[3].mxu0 }
 0x11e   : > { %v986_v57 = vadd.f32 %v2619_v55, %v985_v20 }
 0x11f   : > { %1137 = vst [vmem:[%s2623_s13 + $0x18] sm:$0xff] %v991_v6 }
 0x120   : > { %1136 = vst [vmem:[%s2623_s13 + $0x10] sm:$0xff] %v986_v57 }
 0x121   : > { %v1365_v8 = vpop.f32.mrb[2].mxu1 }
 0x122   : > { %v1071_v36 = vadd.f32 %v1365_v8, %v2619_v55  ;;  %v1065_v1 = vpop.f32.mrb[3].mxu1 }
 0x123   : > { %v1066_v43 = vadd.f32 %v2619_v55, %v1065_v1 }
 0x124   : > { %1153 = vst [vmem:[%s2623_s13 + $0x98] sm:$0xff] %v1071_v36 }
 0x125   : > { %1152 = vst [vmem:[%s2623_s13 + $0x90] sm:$0xff] %v1066_v43 }
 0x12c   : > { %v1344_v30 = vpop.f32.mrb[4].mxu0 }
 0x12d   : > { %v1001_v48 = vadd.f32 %v1344_v30, %v2619_v55  ;;  %v995_v37 = vpop.f32.mrb[5].mxu0 }
 0x12e   : > { %v996_v0 = vadd.f32 %v2619_v55, %v995_v37 }
 0x12f   : > { %1139 = vst [vmem:[%s2623_s13 + $0x28] sm:$0xff] %v1001_v48 }
 0x130   : > { %v1368_v51 = vpop.f32.mrb[4].mxu1  ;;  %1138 = vst [vmem:[%s2623_s13 + $0x20] sm:$0xff] %v996_v0 }
 0x131   : > { %v1081_v9 = vadd.f32 %v1368_v51, %v2619_v55  ;;  %v1075_v26 = vpop.f32.mrb[5].mxu1 }
 0x132   : > { %v1076_v63 = vadd.f32 %v2619_v55, %v1075_v26 }
 0x133   : > { %1155 = vst [vmem:[%s2623_s13 + $0xa8] sm:$0xff] %v1081_v9 }
 0x134   : > { %1154 = vst [vmem:[%s2623_s13 + $0xa0] sm:$0xff] %v1076_v63 }
 0x13d   : > { %v1347_v16 = vpop.f32.mrb[6].mxu0 }
 0x13e   : > { %v1011_v42 = vadd.f32 %v1347_v16, %v2619_v55  ;;  %v1005_v39 = vpop.f32.mrb[7].mxu0 }
 0x13f   : > { %v1006_v2 = vadd.f32 %v2619_v55, %v1005_v39 }
 0x140   : > { %1141 = vst [vmem:[%s2623_s13 + $0x38] sm:$0xff] %v1011_v42 }
 0x141   : > { %1140 = vst [vmem:[%s2623_s13 + $0x30] sm:$0xff] %v1006_v2 }
 0x142   : > { %v1371_v25 = vpop.f32.mrb[6].mxu1 }
 0x143   : > { %v1091_v58 = vadd.f32 %v1371_v25, %v2619_v55  ;;  %v1085_v27 = vpop.f32.mrb[7].mxu1 }
 0x144   : > { %v1086_v50 = vadd.f32 %v2619_v55, %v1085_v27 }
 0x145   : > { %1157 = vst [vmem:[%s2623_s13 + $0xb8] sm:$0xff] %v1091_v58 }
 0x146   : > { %1156 = vst [vmem:[%s2623_s13 + $0xb0] sm:$0xff] %v1086_v50 }
 0x14f   : > { %v1350_v29 = vpop.f32.mrb[8].mxu0 }
 0x150   : > { %v1021_v17 = vadd.f32 %v1350_v29, %v2619_v55  ;;  %v1015_v41 = vpop.f32.mrb[9].mxu0 }
 0x151   : > { %v1016_v22 = vadd.f32 %v2619_v55, %v1015_v41 }
 0x152   : > { %1143 = vst [vmem:[%s2623_s13 + $0x48] sm:$0xff] %v1021_v17  ;;  %v1374_v28 = vpop.f32.mrb[8].mxu1 }
 0x153   : > { %1142 = vst [vmem:[%s2623_s13 + $0x40] sm:$0xff] %v1016_v22  ;;  %v1101_v33 = vadd.f32 %v1374_v28, %v2619_v55  ;;  %v1095_v32 = vpop.f32.mrb[9].mxu1 }
 0x154   : > { %v1096_v7 = vadd.f32 %v2619_v55, %v1095_v32 }
 0x155   : > { %1159 = vst [vmem:[%s2623_s13 + $0xc8] sm:$0xff] %v1101_v33 }
 0x156   : > { %1158 = vst [vmem:[%s2623_s13 + $0xc0] sm:$0xff] %v1096_v7 }
 0x160   : > { %v1353_v14 = vpop.f32.mrb[10].mxu0 }
 0x161   : > { %v1031_v62 = vadd.f32 %v1353_v14, %v2619_v55  ;;  %v1025_v35 = vpop.f32.mrb[11].mxu0 }
 0x162   : > { %v1026_v52 = vadd.f32 %v2619_v55, %v1025_v35 }
 0x163   : > { %1145 = vst [vmem:[%s2623_s13 + $0x58] sm:$0xff] %v1031_v62  ;;  %v1377_v15 = vpop.f32.mrb[10].mxu1 }
 0x164   : > { %1144 = vst [vmem:[%s2623_s13 + $0x50] sm:$0xff] %v1026_v52  ;;  %v1111_v34 = vadd.f32 %v1377_v15, %v2619_v55  ;;  %v1105_v59 = vpop.f32.mrb[11].mxu1 }
 0x165   : > { %v1106_v31 = vadd.f32 %v2619_v55, %v1105_v59 }
 0x166   : > { %1161 = vst [vmem:[%s2623_s13 + $0xd8] sm:$0xff] %v1111_v34 }
 0x167   : > { %1160 = vst [vmem:[%s2623_s13 + $0xd0] sm:$0xff] %v1106_v31 }
 0x171   : > { %v1356_v11 = vpop.f32.mrb[12].mxu0 }
 0x172   : > { %v1041_v19 = vadd.f32 %v1356_v11, %v2619_v55  ;;  %v1035_v24 = vpop.f32.mrb[13].mxu0 }
 0x173   : > { %v1036_v3 = vadd.f32 %v2619_v55, %v1035_v24 }
 0x174   : > { %1147 = vst [vmem:[%s2623_s13 + $0x68] sm:$0xff] %v1041_v19  ;;  %v1380_v23 = vpop.f32.mrb[12].mxu1 }
 0x175   : > { %1146 = vst [vmem:[%s2623_s13 + $0x60] sm:$0xff] %v1036_v3  ;;  %v1121_v47 = vadd.f32 %v1380_v23, %v2619_v55  ;;  %v1115_v38 = vpop.f32.mrb[13].mxu1 }
 0x176   : > { %v1116_v54 = vadd.f32 %v2619_v55, %v1115_v38 }
 0x177   : > { %1163 = vst [vmem:[%s2623_s13 + $0xe8] sm:$0xff] %v1121_v47 }
 0x178   : > { %1162 = vst [vmem:[%s2623_s13 + $0xe0] sm:$0xff] %v1116_v54 }
 0x181   : > { %v1359_v18 = vpop.f32.mrb[14].mxu0 }
 0x182   : > { %v1051_v5 = vadd.f32 %v1359_v18, %v2619_v55  ;;  %v1045_v61 = vpop.f32.mrb[15].mxu0 }
 0x183   : > { %v1046_v53 = vadd.f32 %v2619_v55, %v1045_v61 }
 0x184   : > { %1149 = vst [vmem:[%s2623_s13 + $0x78] sm:$0xff] %v1051_v5 }
 0x185   : > { %v1383_v45 = vpop.f32.mrb[14].mxu1  ;;  %1148 = vst [vmem:[%s2623_s13 + $0x70] sm:$0xff] %v1046_v53 }
 0x186   : > { %v1131_v60 = vadd.f32 %v1383_v45, %v2619_v55  ;;  %v1125_v21 = vpop.f32.mrb[15].mxu1 }
 0x187   : > { %v1126_v13 = vadd.f32 %v2619_v55, %v1125_v21 }
 0x188   : > { %1165 = vst [vmem:[%s2623_s13 + $0xf8] sm:$0xff] %v1131_v60 }
 0x189   : > { %1164 = vst [vmem:[%s2623_s13 + $0xf0] sm:$0xff] %v1126_v13 }
 0x18a   : > { %1500 = shalt.err (!%p1497_p3)
}
 0x18b   : > { %s1501_s7 = scalar_lea.hbm %s2689_s28, 4096  ;;  %s1505_s10 = scalar_lea.hbm %s2743_s4, 8192 }
 0x18c   : > { %p1502_p4 = scmp.ne.s32.totalorder %s2689_s28, %s1501_s7  ;;  %p1506_p9 = scmp.lt.u32.totalorder %s2689_s28, %s2743_s4 }
 0x18d   : > { %p1507_p10 = scmp.lt.u32.totalorder %s1505_s10, %s1501_s7  ;;  %p1509_p12 = scmp.lt.u32.totalorder %s1501_s7, %s2689_s28 }
 0x18e   : > { %p1503_p7 = pnand %p1502_p4, %p1617_p5 }
 0x18f   : > { %p1508_p11 = por %p1507_p10, %p1506_p9 }
 0x190   : > { %p1504_p8 = pneg %p1503_p7 }
 0x191   : > { %p1510_p13 = por %p1509_p12, %p1508_p11 }
 0x193   : > { %p1511_p0 = pnand %p1510_p13, %p1504_p8 }
 0x195   : > { %1514 = shalt.err (!%p1511_p0)
}
 0x196   : > { %s1552_s14 = smov 128   ;;  %s1553_s13 = smov 8  }
 0x197   : > { %1433 = dma.vmem_to_hbm [thread:$0]  (%p1617_p5), %s2691_s22, 4096, %s2689_s28, %s2698_s19, %s1552_s14, %s1552_s14, %s1553_s13  }
 0x198 PF: > { %p1439_p1 = scmp.ge.s32.totalorder %s1549_s18, 2  ;;  %s1195_s20 = sand.u32 1, %s1537_s15  }
 0x199   : > { %s1196_s23 = scalar_lea.sflag [#allocation3], %s1195_s20 }
 0x19a   : > { %p1436_p2 = pnand %p1439_p1, %p1621_p6 }
 0x19c   : > { %1532 = dma.done.wait (!%p1436_p2), %s1196_s23, 4096  }
 0x19d   : > { %1534 = vsyncadd (!%p1436_p2), %s1196_s23, 4294963200  ;;  %p14_p3 = scmp.ge.s32.totalorder %s1604_s21, 4   ;;  %s2755_s15 = smov %s1541_s16 }
 0x19e   : > { %s2756_s16 = smov %s1545_s17  ;;  %s2757_s17 = smov %s1615_s24 }
 0x19f   : > { %s2758_s18 = smov %s1604_s21  ;;  %16 = sbr.rel (!%p14_p3) target bundleno = 3 (0x3), region = 71 }
 0x1a6   :  { %1201 = vsyncpa [#allocation3], 1 }
 0x1a7   :  { %1203 = vsyncpa [#allocation3 + $0x1], 1 }

</bundles_post_ra>
